<compile_context>
chip_gen: v5e
topology: v5e:2x2
jax: 0.10.0
libtpu: 0.0.40
codegen_flags: <defaults>
</compile_context>

<pallas_src>
import functools

import jax
import jax.numpy as jnp
from jax.experimental import pallas as pl
from jax.experimental.pallas import tpu as pltpu


def _softplus(x):
    # Matches torch.nn.Softplus (beta=1, threshold=20): linear above threshold.
    # The clamp also keeps exp() finite on garbage rows of a partial tile.
    return jnp.where(x > 20.0, x, jnp.log1p(jnp.exp(jnp.minimum(x, 20.0))))


def _act_fn(activation: str):
    if activation == "ReLU":
        return lambda z: jnp.maximum(z, 0.0)
    if activation == "Tanh":
        return jnp.tanh
    raise ValueError(f"unsupported activation {activation!r}")


def tasknet_var_kernel(x_ref, w1_ref, b1_ref, w2_ref, b2_ref, w3_ref, b3_ref,
                       *o_refs, activation: str, lod: int):
    """One batch tile of the full MLP head; outputs already split into lod chunks."""
    act = _act_fn(activation)

    x = x_ref[...]  # (TB, d_in) float32 activation tile
    # f32 operands, f32 accumulation (MXU; tiny K/N so precision > throughput).
    h = jnp.dot(x, w1_ref[...], preferred_element_type=jnp.float32) + b1_ref[...]
    h = act(h)
    h = jnp.dot(h, w2_ref[...], preferred_element_type=jnp.float32) + b2_ref[...]
    h = act(h)
    y = jnp.dot(h, w3_ref[...], preferred_element_type=jnp.float32) + b3_ref[...]
    y = _softplus(y) + 1e-4

    # Write the lod-wide splits straight to their own (unpadded) outputs:
    # no dead-lane padding bytes and no wrapper-side slice copies.
    for k, o_ref in enumerate(o_refs):
        o_ref[...] = y[:, k * lod:(k + 1) * lod].astype(o_ref.dtype)


def _round_up(x, m):
    return ((x + m - 1) // m) * m


def _pick_batch_tile(B, batch_tile):
    """Large 8-aligned batch tile to amortize per-grid-step overhead, while
    guaranteeing >=2 grid steps once B is a few hundred rows so v7x's two
    TensorCores both get work (harmless on single-TC v5e/v6e)."""
    if B > batch_tile:
        return batch_tile
    if B >= 256:
        return _round_up((B + 1) // 2, 8)
    return B


def tasknet_var_forward(latent_task_var, params, *, lod: int, diagonal: bool,
                        activation: str, batch_tile: int = 2048,
                        min_pallas_batch: int = 128):
    """Full TaskNetVar forward: MLP -> softplus -> +1e-4 -> split."""
    w1, b1, w2, b2, w3, b3 = params
    B, d_in = latent_task_var.shape
    h0 = w1.shape[1]
    h1 = w2.shape[1]
    lvd = w3.shape[1]
    n_splits = 2 if diagonal else 3
    assert lvd == n_splits * lod

    if B < min_pallas_batch:
        # Latency-bound regime: fused plain-XLA path beats the custom call.
        act = _act_fn(activation)
        h = act(latent_task_var @ w1 + b1)
        h = act(h @ w2 + b2)
        y = jax.nn.softplus(h @ w3 + b3) + 1e-4
        outs = [y[:, k * lod:(k + 1) * lod] for k in range(n_splits)]
    else:
        TB = _pick_batch_tile(B, batch_tile)
        grid = ((B + TB - 1) // TB,)
        # NOTE: if B % TB != 0 the trailing partial block runs the MLP on
        # out-of-bounds rows; Pallas drops the OOB writes so results stay
        # correct (wasted work only), and _softplus clamps so no inf/NaN.

        flops = 2 * B * (d_in * h0 + h0 * h1 + h1 * lvd)
        transcendentals = B * (2 * lvd
                               + ((h0 + h1) if activation == "Tanh" else 0))
        bytes_accessed = (B * d_in * 4 + B * lvd * 4               # x, outputs
                          + 4 * (d_in * h0 + h0 * h1 + h1 * lvd)   # f32 weights
                          + 4 * (h0 + h1 + lvd))                   # f32 biases

        kernel = functools.partial(tasknet_var_kernel,
                                   activation=activation, lod=lod)
        outs = pl.pallas_call(
            kernel,
            out_shape=tuple(jax.ShapeDtypeStruct((B, lod), jnp.float32)
                            for _ in range(n_splits)),
            grid=grid,
            in_specs=[
                pl.BlockSpec((TB, d_in), lambda i: (i, 0)),  # pipelined tiles
                pl.BlockSpec(w1.shape, lambda i: (0, 0)),    # VMEM-resident
                pl.BlockSpec(b1.shape, lambda i: (0, 0)),
                pl.BlockSpec(w2.shape, lambda i: (0, 0)),
                pl.BlockSpec(b2.shape, lambda i: (0, 0)),
                pl.BlockSpec(w3.shape, lambda i: (0, 0)),
                pl.BlockSpec(b3.shape, lambda i: (0, 0)),
            ],
            out_specs=tuple(pl.BlockSpec((TB, lod), lambda i: (i, 0))
                            for _ in range(n_splits)),
            compiler_params=pltpu.CompilerParams(
                dimension_semantics=("parallel",)),
            cost_estimate=pl.CostEstimate(
                flops=flops,
                transcendentals=transcendentals,
                bytes_accessed=bytes_accessed),
        )(latent_task_var, w1, b1, w2, b2, w3, b3)
        outs = list(outs)

    if diagonal:
        outs = outs + [jnp.zeros((B, lod), jnp.float32)]
    return outs


def init_params(key, ltd_half, num_hidden, lvd):
    """Deterministic init matching nn.Linear shapes (W stored as [in, out])."""
    dims = [ltd_half] + list(num_hidden) + [lvd]
    params = []
    for i in range(len(dims) - 1):
        fan_in, fan_out = dims[i], dims[i + 1]
        key, kw, kb = jax.random.split(key, 3)
        bound = 1.0 / jnp.sqrt(fan_in)
        w = jax.random.uniform(kw, (fan_in, fan_out), jnp.float32, -bound, bound)
        b = jax.random.uniform(kb, (1, fan_out), jnp.float32, -bound, bound)
        params += [w, b]
    return params


def reference_forward(x, params, activation):
    w1, b1, w2, b2, w3, b3 = params
    act = _act_fn(activation)
    h = act(x @ w1 + b1)
    h = act(h @ w2 + b2)
    return jax.nn.softplus(h @ w3 + b3) + 1e-4


if __name__ == "__main__":
    # Module hyperparameters (small, consistent with the PyTorch __init__).
    ltd = 32            # -> _ltd = 16 (input dim)
    lsd = 16            # -> _lod = 8
    num_hidden = [32, 32]
    diagonal = False    # -> _lvd = 3 * _lod = 24
    activation = "ReLU"

    ltd_half = ltd // 2
    lod = lsd // 2
    lvd = 2 * lod if diagonal else 3 * lod

    key = jax.random.PRNGKey(0)
    key, kx = jax.random.split(key)
    params = init_params(key, ltd_half, num_hidden, lvd)

    # --- Pallas path (B large enough for the kernel; 2 grid steps) ----------
    B = 384
    x = jax.random.normal(kx, (B, ltd_half), jnp.float32)
    outs = tasknet_var_forward(x, params, lod=lod, diagonal=diagonal,
                               activation=activation)
    outs = [jax.block_until_ready(o) for o in outs]

    ref = reference_forward(x, params, activation)
    full = jnp.concatenate(outs, axis=1)
    assert full.shape == (B, 3 * lod)
    assert all(o.shape == (B, lod) for o in outs)
    assert jnp.allclose(full, ref, atol=1e-2, rtol=1e-2)
    assert bool(jnp.all(full > 0.0))  # softplus + 1e-4 is strictly positive

    # --- small-batch fallback path (plain fused XLA), semantic parity -------
    xs = x[:8]
    outs_s = tasknet_var_forward(xs, params, lod=lod, diagonal=diagonal,
                                 activation=activation)
    full_s = jnp.concatenate([jax.block_until_ready(o) for o in outs_s], axis=1)
    assert jnp.allclose(full_s, reference_forward(xs, params, activation),
                        atol=1e-2, rtol=1e-2)

    print("KERNEL_OK")
</pallas_src>

<mosaic_0001>
module attributes {stable_mosaic.version = 11 : i64} {
  func.func @tasknet_var_kernel(%arg0: i32, %arg1: memref<192x16xf32, #tpu.memory_space<vmem>>, %arg2: memref<16x32xf32, #tpu.memory_space<vmem>>, %arg3: memref<1x32xf32, #tpu.memory_space<vmem>>, %arg4: memref<32x32xf32, #tpu.memory_space<vmem>>, %arg5: memref<1x32xf32, #tpu.memory_space<vmem>>, %arg6: memref<32x24xf32, #tpu.memory_space<vmem>>, %arg7: memref<1x24xf32, #tpu.memory_space<vmem>>, %arg8: memref<192x8xf32, #tpu.memory_space<vmem>>, %arg9: memref<192x8xf32, #tpu.memory_space<vmem>>, %arg10: memref<192x8xf32, #tpu.memory_space<vmem>>) attributes {dimension_semantics = [#tpu.dimension_semantics<parallel>], iteration_bounds = array<i64: 2>, scalar_prefetch = 0 : i64, scratch_operands = 0 : i64, tpu.core_type = #tpu.core_type<tc>, window_params = [{transform_indices = @transform_0, window_bounds = array<i64: 192, 16>}, {pipeline_mode = #tpu.pipeline_mode<synchronous>, transform_indices = @transform_1, window_bounds = array<i64: 16, 32>}, {pipeline_mode = #tpu.pipeline_mode<synchronous>, transform_indices = @transform_2, window_bounds = array<i64: 1, 32>}, {pipeline_mode = #tpu.pipeline_mode<synchronous>, transform_indices = @transform_3, window_bounds = array<i64: 32, 32>}, {pipeline_mode = #tpu.pipeline_mode<synchronous>, transform_indices = @transform_4, window_bounds = array<i64: 1, 32>}, {pipeline_mode = #tpu.pipeline_mode<synchronous>, transform_indices = @transform_5, window_bounds = array<i64: 32, 24>}, {pipeline_mode = #tpu.pipeline_mode<synchronous>, transform_indices = @transform_6, window_bounds = array<i64: 1, 24>}, {transform_indices = @transform_7, window_bounds = array<i64: 192, 8>}, {transform_indices = @transform_8, window_bounds = array<i64: 192, 8>}, {transform_indices = @transform_9, window_bounds = array<i64: 192, 8>}]} {
    %c0 = arith.constant 0 : index
    %c0_0 = arith.constant 0 : index
    %0 = vector.load %arg1[%c0, %c0_0] : memref<192x16xf32, #tpu.memory_space<vmem>>, vector<192x16xf32>
    %c0_1 = arith.constant 0 : index
    %c0_2 = arith.constant 0 : index
    %1 = vector.load %arg2[%c0_1, %c0_2] : memref<16x32xf32, #tpu.memory_space<vmem>>, vector<16x32xf32>
    %cst = arith.constant dense<0.000000e+00> : vector<192x32xf32>
    %2 = tpu.matmul %0, %1, %cst {dimension_numbers = #tpu.dot_dimension_numbers<[1], [0], [0], [1], [0, 0, 1, 1], [], []>} : vector<192x16xf32>, vector<16x32xf32>, vector<192x32xf32> -> vector<192x32xf32>
    %c0_3 = arith.constant 0 : index
    %c0_4 = arith.constant 0 : index
    %3 = vector.load %arg3[%c0_3, %c0_4] : memref<1x32xf32, #tpu.memory_space<vmem>>, vector<1x32xf32>
    %4 = vector.broadcast %3 : vector<1x32xf32> to vector<192x32xf32>
    %5 = arith.addf %2, %4 : vector<192x32xf32>
    %cst_5 = arith.constant 0.000000e+00 : f32
    %6 = vector.broadcast %cst_5 : f32 to vector<192x32xf32>
    %7 = arith.maximumf %5, %6 : vector<192x32xf32>
    %c0_6 = arith.constant 0 : index
    %c0_7 = arith.constant 0 : index
    %8 = vector.load %arg4[%c0_6, %c0_7] : memref<32x32xf32, #tpu.memory_space<vmem>>, vector<32x32xf32>
    %cst_8 = arith.constant dense<0.000000e+00> : vector<192x32xf32>
    %9 = tpu.matmul %7, %8, %cst_8 {dimension_numbers = #tpu.dot_dimension_numbers<[1], [0], [0], [1], [0, 0, 1, 1], [], []>} : vector<192x32xf32>, vector<32x32xf32>, vector<192x32xf32> -> vector<192x32xf32>
    %c0_9 = arith.constant 0 : index
    %c0_10 = arith.constant 0 : index
    %10 = vector.load %arg5[%c0_9, %c0_10] : memref<1x32xf32, #tpu.memory_space<vmem>>, vector<1x32xf32>
    %11 = vector.broadcast %10 : vector<1x32xf32> to vector<192x32xf32>
    %12 = arith.addf %9, %11 : vector<192x32xf32>
    %cst_11 = arith.constant 0.000000e+00 : f32
    %13 = vector.broadcast %cst_11 : f32 to vector<192x32xf32>
    %14 = arith.maximumf %12, %13 : vector<192x32xf32>
    %c0_12 = arith.constant 0 : index
    %c0_13 = arith.constant 0 : index
    %15 = vector.load %arg6[%c0_12, %c0_13] : memref<32x24xf32, #tpu.memory_space<vmem>>, vector<32x24xf32>
    %cst_14 = arith.constant dense<0.000000e+00> : vector<192x24xf32>
    %16 = tpu.matmul %14, %15, %cst_14 {dimension_numbers = #tpu.dot_dimension_numbers<[1], [0], [0], [1], [0, 0, 1, 1], [], []>} : vector<192x32xf32>, vector<32x24xf32>, vector<192x24xf32> -> vector<192x24xf32>
    %c0_15 = arith.constant 0 : index
    %c0_16 = arith.constant 0 : index
    %17 = vector.load %arg7[%c0_15, %c0_16] : memref<1x24xf32, #tpu.memory_space<vmem>>, vector<1x24xf32>
    %18 = vector.broadcast %17 : vector<1x24xf32> to vector<192x24xf32>
    %19 = arith.addf %16, %18 : vector<192x24xf32>
    %cst_17 = arith.constant 2.000000e+01 : f32
    %20 = vector.broadcast %cst_17 : f32 to vector<192x24xf32>
    %21 = arith.cmpf ogt, %19, %20 : vector<192x24xf32>
    %cst_18 = arith.constant 2.000000e+01 : f32
    %22 = vector.broadcast %cst_18 : f32 to vector<192x24xf32>
    %23 = arith.minimumf %19, %22 : vector<192x24xf32>
    %24 = math.exp %23 : vector<192x24xf32>
    %25 = math.log1p %24 : vector<192x24xf32>
    %26 = arith.select %21, %19, %25 : vector<192x24xi1>, vector<192x24xf32>
    %cst_19 = arith.constant 9.99999974E-5 : f32
    %27 = vector.broadcast %cst_19 : f32 to vector<192x24xf32>
    %28 = arith.addf %26, %27 : vector<192x24xf32>
    %29 = vector.extract_strided_slice %28 {offsets = [0, 0], sizes = [192, 8], strides = [1, 1]} : vector<192x24xf32> to vector<192x8xf32>
    %c0_20 = arith.constant 0 : index
    %c0_21 = arith.constant 0 : index
    %30 = vector.load %arg8[%c0_20, %c0_21] : memref<192x8xf32, #tpu.memory_space<vmem>>, vector<192x8xf32>
    tpu.vector_store %arg8[%c0_20, %c0_21], %29 {strides = array<i32>} : memref<192x8xf32, #tpu.memory_space<vmem>>, vector<192x8xf32>,
    %31 = vector.extract_strided_slice %28 {offsets = [0, 8], sizes = [192, 8], strides = [1, 1]} : vector<192x24xf32> to vector<192x8xf32>
    %c0_22 = arith.constant 0 : index
    %c0_23 = arith.constant 0 : index
    %32 = vector.load %arg9[%c0_22, %c0_23] : memref<192x8xf32, #tpu.memory_space<vmem>>, vector<192x8xf32>
    tpu.vector_store %arg9[%c0_22, %c0_23], %31 {strides = array<i32>} : memref<192x8xf32, #tpu.memory_space<vmem>>, vector<192x8xf32>,
    %33 = vector.extract_strided_slice %28 {offsets = [0, 16], sizes = [192, 8], strides = [1, 1]} : vector<192x24xf32> to vector<192x8xf32>
    %c0_24 = arith.constant 0 : index
    %c0_25 = arith.constant 0 : index
    %34 = vector.load %arg10[%c0_24, %c0_25] : memref<192x8xf32, #tpu.memory_space<vmem>>, vector<192x8xf32>
    tpu.vector_store %arg10[%c0_24, %c0_25], %33 {strides = array<i32>} : memref<192x8xf32, #tpu.memory_space<vmem>>, vector<192x8xf32>,
    return
  }
  func.func @transform_0(%arg0: i32) -> (i32, i32) {
    %c0_i32 = arith.constant 0 : i32
    %c0_i32_0 = arith.constant 0 : i32
    return %arg0, %c0_i32 : i32, i32
  }
  func.func @transform_1(%arg0: i32) -> (i32, i32) {
    %c0_i32 = arith.constant 0 : i32
    %c0_i32_0 = arith.constant 0 : i32
    %c0_i32_1 = arith.constant 0 : i32
    return %c0_i32, %c0_i32_0 : i32, i32
  }
  func.func @transform_2(%arg0: i32) -> (i32, i32) {
    %c0_i32 = arith.constant 0 : i32
    %c0_i32_0 = arith.constant 0 : i32
    %c0_i32_1 = arith.constant 0 : i32
    return %c0_i32, %c0_i32_0 : i32, i32
  }
  func.func @transform_3(%arg0: i32) -> (i32, i32) {
    %c0_i32 = arith.constant 0 : i32
    %c0_i32_0 = arith.constant 0 : i32
    %c0_i32_1 = arith.constant 0 : i32
    return %c0_i32, %c0_i32_0 : i32, i32
  }
  func.func @transform_4(%arg0: i32) -> (i32, i32) {
    %c0_i32 = arith.constant 0 : i32
    %c0_i32_0 = arith.constant 0 : i32
    %c0_i32_1 = arith.constant 0 : i32
    return %c0_i32, %c0_i32_0 : i32, i32
  }
  func.func @transform_5(%arg0: i32) -> (i32, i32) {
    %c0_i32 = arith.constant 0 : i32
    %c0_i32_0 = arith.constant 0 : i32
    %c0_i32_1 = arith.constant 0 : i32
    return %c0_i32, %c0_i32_0 : i32, i32
  }
  func.func @transform_6(%arg0: i32) -> (i32, i32) {
    %c0_i32 = arith.constant 0 : i32
    %c0_i32_0 = arith.constant 0 : i32
    %c0_i32_1 = arith.constant 0 : i32
    return %c0_i32, %c0_i32_0 : i32, i32
  }
  func.func @transform_7(%arg0: i32) -> (i32, i32) {
    %c0_i32 = arith.constant 0 : i32
    %c0_i32_0 = arith.constant 0 : i32
    return %arg0, %c0_i32 : i32, i32
  }
  func.func @transform_8(%arg0: i32) -> (i32, i32) {
    %c0_i32 = arith.constant 0 : i32
    %c0_i32_0 = arith.constant 0 : i32
    return %arg0, %c0_i32 : i32, i32
  }
  func.func @transform_9(%arg0: i32) -> (i32, i32) {
    %c0_i32 = arith.constant 0 : i32
    %c0_i32_0 = arith.constant 0 : i32
    return %arg0, %c0_i32 : i32, i32
  }
}

</mosaic_0001>

<bundles_post_ra>
// kernel: tpu_custom_call.1
= control target key start
LH: loop header
LB: loop body
LE: loop exit
PB: predicated region body
PF: predicated region fallthrough
CT: control target
= control target key end

     0   :  { %s1930_s30 = smov 0   ;;  %s2489_s0 = inlined_call_operand.vmem [shape: f32[384,16], index: 0, kind: input, shape index: {}]   ;;  %s2490_s1 = inlined_call_operand.vmem [shape: f32[16,32], index: 1, kind: input, shape index: {}]   ;;  %s2491_s2 = inlined_call_operand.vmem [shape: f32[1,32], index: 2, kind: input, shape index: {}]   ;;  %s2492_s3 = inlined_call_operand.vmem [shape: f32[32,32], index: 3, kind: input, shape index: {}]   ;;  %s2493_s4 = inlined_call_operand.vmem [shape: f32[1,32], index: 4, kind: input, shape index: {}]   ;;  %s2494_s5 = inlined_call_operand.vmem [shape: f32[32,24], index: 5, kind: input, shape index: {}]   ;;  %s2495_s6 = inlined_call_operand.vmem [shape: f32[1,24], index: 6, kind: input, shape index: {}]   ;;  %s2496_s7 = inlined_call_operand.vmem [shape: f32[384,8], index: 7, kind: output, shape index: {0}]   ;;  %s2497_s8 = inlined_call_operand.vmem [shape: f32[384,8], index: 8, kind: output, shape index: {1}]   ;;  %s2498_s9 = inlined_call_operand.vmem [shape: f32[384,8], index: 9, kind: output, shape index: {2}]  }
   0x1 LB: > { %s1667_s10 = sadd.s32 4294967295, %s1876_s30   ;;  %p1671_p0 = scmp.ge.s32.totalorder %s1876_s30, 1  ;;  %s1876_s30 = sphi %s1930_s30, %s20_s30  }
   0x2   : > { %p293_p1 = scmp.lt.s32.totalorder %s1876_s30, 3 }
   0x4   : > { %p294_p2 = pnand %p1671_p0, %p293_p1 }
   0x5   : > { %s339_s15 = smul.u32 (!%p294_p2), 24, %s1667_s10  ;;  %s1878_s26 = smov (!%p294_p2), 120  }
   0x6   : > { %297 = sbr.rel (%p294_p2) target bundleno = 741 (0x2e5), region = 48  ;;  %s1879_s27 = smov (!%p294_p2), 112  }
   0x7   : > { %p340_p3 = scmp.lt.s32.totalorder (!%p294_p2), %s339_s15, 47 }
   0xb   : > { %v388_v0 = vld [vmem:[%s2490_s1 + $0x8] sm:$0xff]  ;;  %v387_v1 = vld [vmem:[%s2490_s1] sm:$0xff]  ;;  %s2500_s15 = smov (!%p340_p3, %s339_s15), 47  ;;  %vm393_vm0 = vcmask 130048   ;;  %v582_v14 = vld [vmem:[%s2492_s3 + $0x18] sm:$0xff]  ;;  %vm587_vm1 = vcmask 261120  }
   0xc   : > { %480 = vmatpush.msra.mxu0 %v388_v0  ;;  %1750 = vmatpush.msra.mxu3 %v388_v0  ;;  %s1944_s16 = sshll.u32 %s2500_s15, 3  ;;  %v581_v15 = vld [vmem:[%s2492_s3 + $0x10] sm:$0xff]  ;;  %v580_v17 = vld [vmem:[%s2492_s3 + $0x8] sm:$0xff]  ;;  %v579_v18 = vld [vmem:[%s2492_s3] sm:$0xff]  ;;  %vm1302_vm4 = vcmask 64512  }
   0xd   : > { %s1950_s19 = scalar_lea.vmem %s2489_s0, %s1944_s16  ;;  %672 = vmatpush.msra.mxu1 %v582_v14  ;;  %v2003_v24 = vld [vmem:[%s2491_s2] ss:$0 sm:$0xff]  ;;  %s2142_s25 = scalar_lea.vmem %s2496_s7, %s1944_s16 }
   0xe   : > { %481 = vmatpush.msra.mxu0 %v387_v1  ;;  %1751 = vmatpush.msra.mxu3 %v387_v1  ;;  %v363_v2 = vld [vmem:[%s1950_s19] sm:$0xff]  ;;  %v364_v3 = vld [vmem:[%s1950_s19 + $0x8] sm:$0xff]  ;;  %v365_v4 = vld [vmem:[%s1950_s19 + $0x10] sm:$0xff]  ;;  %s2291_s10 = scalar_lea.vmem %s2498_s9, %s1944_s16  ;;  %s2309_s13 = scalar_lea.vmem %s2497_s8, %s1944_s16 }
   0xf   : > { %1676 = vmatmul.msk.f32.vlgmr.msra.gmra.mxu0 %vm393_vm0, %v363_v2  ;;  %v366_v5 = vld [vmem:[%s1950_s19 + $0x18] sm:$0xff]  ;;  %v367_v6 = vld [vmem:[%s1950_s19 + $0x20] sm:$0xff]  ;;  %v368_v7 = vld [vmem:[%s1950_s19 + $0x28] sm:$0xff]  ;;  %673 = vmatpush.msra.mxu1 %v581_v15 }
  0x10   : > { %v369_v8 = vld [vmem:[%s1950_s19 + $0x30] sm:$0xff]  ;;  %v370_v9 = vld [vmem:[%s1950_s19 + $0x38] sm:$0xff]  ;;  %v371_v10 = vld [vmem:[%s1950_s19 + $0x40] sm:$0xff]  ;;  %1752 = vmatpush.msrb.mxu3 %v582_v14 }
  0x11   : > { %v372_v11 = vld [vmem:[%s1950_s19 + $0x48] sm:$0xff]  ;;  %v373_v12 = vld [vmem:[%s1950_s19 + $0x50] sm:$0xff]  ;;  %v374_v13 = vld [vmem:[%s1950_s19 + $0x58] sm:$0xff]  ;;  %674 = vmatpush.msra.mxu1 %v580_v17 }
  0x12   : > { %v375_v16 = vld [vmem:[%s1950_s19 + $0x60] sm:$0xff]  ;;  %1753 = vmatpush.msrb.mxu3 %v581_v15  ;;  %v376_v19 = vld [vmem:[%s1950_s19 + $0x68] sm:$0xff]  ;;  %v377_v20 = vld [vmem:[%s1950_s19 + $0x70] sm:$0xff] }
  0x13   : > { %675 = vmatpush.msra.mxu1 %v579_v18  ;;  %v382_v21 = vld [vmem:[%s1950_s19 + $0x98] sm:$0xff]  ;;  %v383_v23 = vld [vmem:[%s1950_s19 + $0xa0] sm:$0xff]  ;;  %v384_v29 = vld [vmem:[%s1950_s19 + $0xa8] sm:$0xff] }
  0x14   : > { %1754 = vmatpush.msrb.mxu3 %v580_v17  ;;  %v378_v22 = vld [vmem:[%s1950_s19 + $0x78] sm:$0xff]  ;;  %v379_v26 = vld [vmem:[%s1950_s19 + $0x80] sm:$0xff]  ;;  %v380_v31 = vld [vmem:[%s1950_s19 + $0x88] sm:$0xff] }
  0x15   : > { %1695 = vmatmul.msk.f32.vlgmr.msra.gmra.mxu3 %vm393_vm0, %v382_v21  ;;  %v385_v34 = vld [vmem:[%s1950_s19 + $0xb0] sm:$0xff]  ;;  %v386_v39 = vld [vmem:[%s1950_s19 + $0xb8] sm:$0xff] }
  0x16   : > { %1755 = vmatpush.msrb.mxu3 %v579_v18  ;;  %v381_v36 = vld [vmem:[%s1950_s19 + $0x90] sm:$0xff] }
  0x17   : > { %1677 = vmatmul.msk.f32.gmra.mxu0 %vm393_vm0, %v364_v3  ;;  %v776_v3 = vld [vmem:[%s2494_s5 + $0x18] sm:$0xff] }
  0x18   : > { %865 = vmatpush.msra.mxu2 %v776_v3  ;;  %1756 = vmatpush.msra.mxu3 %v776_v3 }
  0x1d   : > { %1696 = vmatmul.msk.f32.gmra.mxu3 %vm393_vm0, %v383_v23 }
  0x1f   : > { %1678 = vmatmul.msk.f32.gmra.mxu0 %vm393_vm0, %v365_v4 }
  0x25   : > { %1697 = vmatmul.msk.f32.gmra.mxu3 %vm393_vm0, %v384_v29 }
  0x27   : > { %1679 = vmatmul.msk.f32.gmra.mxu0 %vm393_vm0, %v366_v5 }
  0x2d   : > { %1698 = vmatmul.msk.f32.gmra.mxu3 %vm393_vm0, %v385_v34 }
  0x2f   : > { %1680 = vmatmul.msk.f32.gmra.mxu0 %vm393_vm0, %v367_v6  ;;  %v775_v6 = vld [vmem:[%s2494_s5 + $0x10] sm:$0xff] }
  0x30   : > { %866 = vmatpush.msra.mxu2 %v775_v6  ;;  %1757 = vmatpush.msra.mxu3 %v775_v6 }
  0x35   : > { %1699 = vmatmul.msk.f32.gmra.mxu3 %vm393_vm0, %v386_v39 }
  0x37   : > { %1681 = vmatmul.msk.f32.gmra.mxu0 %vm393_vm0, %v368_v7 }
  0x3f   : > { %1682 = vmatmul.msk.f32.gmra.mxu0 %vm393_vm0, %v369_v8  ;;  %v774_v8 = vld [vmem:[%s2494_s5 + $0x8] sm:$0xff] }
  0x40   : > { %867 = vmatpush.msra.mxu2 %v774_v8  ;;  %1758 = vmatpush.msra.mxu3 %v774_v8 }
  0x47   : > { %1683 = vmatmul.msk.f32.gmra.mxu0 %vm393_vm0, %v370_v9  ;;  %v773_v9 = vld [vmem:[%s2494_s5] sm:$0xff] }
  0x48   : > { %868 = vmatpush.msra.mxu2 %v773_v9  ;;  %1759 = vmatpush.msra.mxu3 %v773_v9 }
  0x4f   : > { %1684 = vmatmul.msk.f32.gmra.mxu0 %vm393_vm0, %v371_v10 }
  0x57   : > { %1685 = vmatmul.msk.f32.gmra.mxu0 %vm393_vm0, %v372_v11 }
  0x5f   : > { %1686 = vmatmul.msk.f32.gmra.mxu0 %vm393_vm0, %v373_v12 }
  0x67   : > { %1687 = vmatmul.msk.f32.gmra.mxu0 %vm393_vm0, %v374_v13 }
  0x6f   : > { %1688 = vmatmul.msk.f32.gmra.mxu0 %vm393_vm0, %v375_v16 }
  0x77   : > { %1689 = vmatmul.msk.f32.gmra.mxu0 %vm393_vm0, %v376_v19  ;;  %v2064_v19 = vld [vmem:[%s2493_s4] ss:$0 sm:$0xff] }
  0x7f   : > { %1690 = vmatmul.msk.f32.gmra.mxu0 %vm393_vm0, %v377_v20 }
  0x87   : > { %1691 = vmatmul.msk.f32.gmra.mxu0 %vm393_vm0, %v378_v22 }
  0x8c   : > { %v483_v25 = vpop.f32.mrf.mxu0 }
  0x8d   : > { %v484_v27 = vadd.f32 %v2003_v24, %v483_v25 }
  0x8f   : > { %v555_v28 = vmax.f32 %v484_v27, 0.0  ;;  %1692 = vmatmul.msk.f32.gmra.mxu0 %vm393_vm0, %v379_v26 }
  0x91   : > { %1700 = vmatmul.msk.f32.vlgmr.msra.gmra.mxu1 %vm587_vm1, %v555_v28 }
  0x94   : > { %v486_v30 = vpop.f32.mrf.mxu0 }
  0x95   : > { %v487_v32 = vadd.f32 %v2003_v24, %v486_v30 }
  0x97   : > { %v556_v33 = vmax.f32 %v487_v32, 0.0  ;;  %1693 = vmatmul.msk.f32.gmra.mxu0 %vm393_vm0, %v380_v31 }
  0x98   : > { %v540_v30 = vpop.f32.mrf.mxu3 }
  0x99   : > { %1701 = vmatmul.msk.f32.gmra.mxu1 %vm587_vm1, %v556_v33 }
  0x9c   : > { %v489_v35 = vpop.f32.mrf.mxu0 }
  0x9d   : > { %v490_v37 = vadd.f32 %v2003_v24, %v489_v35 }
  0x9f   : > { %v557_v38 = vmax.f32 %v490_v37, 0.0  ;;  %1694 = vmatmul.msk.f32.gmra.mxu0 %vm393_vm0, %v381_v36 }
  0xa0   : > { %v543_v39 = vpop.f32.mrf.mxu3 }
  0xa1   : > { %1702 = vmatmul.msk.f32.gmra.mxu1 %vm587_vm1, %v557_v38 }
  0xa4   : > { %v492_v40 = vpop.f32.mrf.mxu0 }
  0xa5   : > { %v493_v41 = vadd.f32 %v2003_v24, %v492_v40 }
  0xa7   : > { %v558_v42 = vmax.f32 %v493_v41, 0.0  ;;  %v541_v41 = vadd.f32 %v2003_v24, %v540_v30 }
  0xa9   : > { %1703 = vmatmul.msk.f32.gmra.mxu1 %vm587_vm1, %v558_v42  ;;  %v574_v42 = vmax.f32 %v541_v41, 0.0 }
  0xac   : > { %v495_v43 = vpop.f32.mrf.mxu0 }
  0xad   : > { %v496_v44 = vadd.f32 %v2003_v24, %v495_v43 }
  0xaf   : > { %v559_v45 = vmax.f32 %v496_v44, 0.0 }
  0xb1   : > { %1704 = vmatmul.msk.f32.gmra.mxu1 %vm587_vm1, %v559_v45 }
  0xb4   : > { %v498_v46 = vpop.f32.mrf.mxu0 }
  0xb5   : > { %v499_v47 = vadd.f32 %v2003_v24, %v498_v46  ;;  %v544_v46 = vadd.f32 %v2003_v24, %v543_v39 }
  0xb7   : > { %v560_v48 = vmax.f32 %v499_v47, 0.0  ;;  %v546_v47 = vpop.f32.mrf.mxu3 }
  0xb9   : > { %1705 = vmatmul.msk.f32.gmra.mxu1 %vm587_vm1, %v560_v48  ;;  %v575_v48 = vmax.f32 %v544_v46, 0.0 }
  0xbc   : > { %v501_v49 = vpop.f32.mrf.mxu0 }
  0xbd   : > { %v502_v50 = vadd.f32 %v2003_v24, %v501_v49 }
  0xbf   : > { %v561_v51 = vmax.f32 %v502_v50, 0.0 }
  0xc1   : > { %1706 = vmatmul.msk.f32.gmra.mxu1 %vm587_vm1, %v561_v51 }
  0xc4   : > { %v504_v52 = vpop.f32.mrf.mxu0 }
  0xc5   : > { %v505_v53 = vadd.f32 %v2003_v24, %v504_v52  ;;  %v547_v52 = vadd.f32 %v2003_v24, %v546_v47 }
  0xc7   : > { %v562_v54 = vmax.f32 %v505_v53, 0.0  ;;  %v549_v53 = vpop.f32.mrf.mxu3 }
  0xc9   : > { %1707 = vmatmul.msk.f32.gmra.mxu1 %vm587_vm1, %v562_v54  ;;  %v576_v54 = vmax.f32 %v547_v52, 0.0 }
  0xcc   : > { %v507_v55 = vpop.f32.mrf.mxu0 }
  0xcd   : > { %v508_v56 = vadd.f32 %v2003_v24, %v507_v55 }
  0xcf   : > { %v563_v57 = vmax.f32 %v508_v56, 0.0 }
  0xd1   : > { %1708 = vmatmul.msk.f32.gmra.mxu1 %vm587_vm1, %v563_v57 }
  0xd4   : > { %v510_v58 = vpop.f32.mrf.mxu0 }
  0xd5   : > { %v511_v59 = vadd.f32 %v2003_v24, %v510_v58  ;;  %v550_v58 = vadd.f32 %v2003_v24, %v549_v53 }
  0xd7   : > { %v564_v60 = vmax.f32 %v511_v59, 0.0  ;;  %v577_v59 = vmax.f32 %v550_v58, 0.0 }
  0xd9   : > { %1709 = vmatmul.msk.f32.gmra.mxu1 %vm587_vm1, %v564_v60 }
  0xdc   : > { %v513_v61 = vpop.f32.mrf.mxu0 }
  0xdd   : > { %v514_v62 = vadd.f32 %v2003_v24, %v513_v61  ;;  %v552_v61 = vpop.f32.mrf.mxu3 }
  0xdf   : > { %v565_v63 = vmax.f32 %v514_v62, 0.0 }
  0xe1   : > { %1710 = vmatmul.msk.f32.gmra.mxu1 %vm587_vm1, %v565_v63 }
  0xe4   : > { %v516_v0 = vpop.f32.mrf.mxu0 }
  0xe5   : > { %v517_v1 = vadd.f32 %v2003_v24, %v516_v0  ;;  %v553_v0 = vadd.f32 %v2003_v24, %v552_v61 }
  0xe7   : > { %v566_v2 = vmax.f32 %v517_v1, 0.0  ;;  %v578_v1 = vmax.f32 %v553_v0, 0.0 }
  0xe9   : > { %1711 = vmatmul.msk.f32.gmra.mxu1 %vm587_vm1, %v566_v2 }
  0xec   : > { %v519_v4 = vpop.f32.mrf.mxu0 }
  0xed   : > { %v520_v5 = vadd.f32 %v2003_v24, %v519_v4 }
  0xef   : > { %v567_v7 = vmax.f32 %v520_v5, 0.0 }
  0xf1   : > { %1712 = vmatmul.msk.f32.gmra.mxu1 %vm587_vm1, %v567_v7 }
  0xf4   : > { %v522_v10 = vpop.f32.mrf.mxu0 }
  0xf5   : > { %v523_v11 = vadd.f32 %v2003_v24, %v522_v10 }
  0xf7   : > { %v568_v12 = vmax.f32 %v523_v11, 0.0 }
  0xf9   : > { %1713 = vmatmul.msk.f32.gmra.mxu1 %vm587_vm1, %v568_v12 }
  0xfc   : > { %v525_v13 = vpop.f32.mrf.mxu0 }
  0xfd   : > { %v526_v14 = vadd.f32 %v2003_v24, %v525_v13 }
  0xff   : > { %v569_v15 = vmax.f32 %v526_v14, 0.0 }
 0x101   : > { %1714 = vmatmul.msk.f32.gmra.mxu1 %vm587_vm1, %v569_v15 }
 0x104   : > { %v528_v16 = vpop.f32.mrf.mxu0 }
 0x105   : > { %v529_v17 = vadd.f32 %v2003_v24, %v528_v16 }
 0x107   : > { %v570_v18 = vmax.f32 %v529_v17, 0.0 }
 0x109   : > { %1715 = vmatmul.msk.f32.gmra.mxu1 %vm587_vm1, %v570_v18 }
 0x10c   : > { %v531_v20 = vpop.f32.mrf.mxu0 }
 0x10d   : > { %v532_v21 = vadd.f32 %v2003_v24, %v531_v20 }
 0x10e   : > { %v677_v22 = vpop.f32.mrf.mxu1 }
 0x10f   : > { %v571_v23 = vmax.f32 %v532_v21, 0.0  ;;  %v678_v25 = vadd.f32 %v2064_v19, %v677_v22 }
 0x111   : > { %v749_v26 = vmax.f32 %v678_v25, 0.0  ;;  %1716 = vmatmul.msk.f32.gmra.mxu1 %vm587_vm1, %v571_v23 }
 0x113   : > { %1724 = vmatmul.msk.f32.vlgmr.msra.gmra.mxu2 %vm587_vm1, %v749_v26 }
 0x114   : > { %v534_v27 = vpop.f32.mrf.mxu0 }
 0x115   : > { %v535_v28 = vadd.f32 %v2003_v24, %v534_v27 }
 0x116   : > { %v680_v29 = vpop.f32.mrf.mxu1 }
 0x117   : > { %v572_v31 = vmax.f32 %v535_v28, 0.0  ;;  %v681_v32 = vadd.f32 %v2064_v19, %v680_v29 }
 0x119   : > { %v750_v33 = vmax.f32 %v681_v32, 0.0  ;;  %1717 = vmatmul.msk.f32.gmra.mxu1 %vm587_vm1, %v572_v31 }
 0x11b   : > { %1725 = vmatmul.msk.f32.gmra.mxu2 %vm587_vm1, %v750_v33  ;;  %v2119_v33 = vld [vmem:[%s2495_s6] ss:$0 sm:$0xff] }
 0x11c   : > { %v537_v34 = vpop.f32.mrf.mxu0 }
 0x11d   : > { %v538_v35 = vadd.f32 %v2003_v24, %v537_v34 }
 0x11e   : > { %v683_v36 = vpop.f32.mrf.mxu1 }
 0x11f   : > { %v573_v37 = vmax.f32 %v538_v35, 0.0  ;;  %v684_v38 = vadd.f32 %v2064_v19, %v683_v36 }
 0x121   : > { %v751_v40 = vmax.f32 %v684_v38, 0.0  ;;  %1718 = vmatmul.msk.f32.vlgmr.msrb.gmra.mxu3 %vm587_vm1, %v573_v37 }
 0x123   : > { %1726 = vmatmul.msk.f32.gmra.mxu2 %vm587_vm1, %v751_v40 }
 0x126   : > { %v686_v43 = vpop.f32.mrf.mxu1 }
 0x127   : > { %v687_v44 = vadd.f32 %v2064_v19, %v686_v43 }
 0x129   : > { %v752_v45 = vmax.f32 %v687_v44, 0.0  ;;  %1719 = vmatmul.msk.f32.gmra.mxu3 %vm587_vm1, %v574_v42 }
 0x12b   : > { %1727 = vmatmul.msk.f32.gmra.mxu2 %vm587_vm1, %v752_v45 }
 0x12e   : > { %v689_v49 = vpop.f32.mrf.mxu1 }
 0x12f   : > { %v690_v50 = vadd.f32 %v2064_v19, %v689_v49 }
 0x131   : > { %v753_v51 = vmax.f32 %v690_v50, 0.0  ;;  %1720 = vmatmul.msk.f32.gmra.mxu3 %vm587_vm1, %v575_v48 }
 0x133   : > { %1728 = vmatmul.msk.f32.gmra.mxu2 %vm587_vm1, %v753_v51 }
 0x136   : > { %v692_v55 = vpop.f32.mrf.mxu1 }
 0x137   : > { %v693_v56 = vadd.f32 %v2064_v19, %v692_v55 }
 0x139   : > { %v754_v57 = vmax.f32 %v693_v56, 0.0  ;;  %1721 = vmatmul.msk.f32.gmra.mxu3 %vm587_vm1, %v576_v54 }
 0x13b   : > { %1729 = vmatmul.msk.f32.gmra.mxu2 %vm587_vm1, %v754_v57 }
 0x13e   : > { %v695_v60 = vpop.f32.mrf.mxu1 }
 0x13f   : > { %v696_v62 = vadd.f32 %v2064_v19, %v695_v60 }
 0x141   : > { %v755_v63 = vmax.f32 %v696_v62, 0.0  ;;  %1722 = vmatmul.msk.f32.gmra.mxu3 %vm587_vm1, %v577_v59 }
 0x143   : > { %1730 = vmatmul.msk.f32.gmra.mxu2 %vm587_vm1, %v755_v63 }
 0x146   : > { %v698_v2 = vpop.f32.mrf.mxu1 }
 0x147   : > { %v699_v3 = vadd.f32 %v2064_v19, %v698_v2 }
 0x149   : > { %v756_v4 = vmax.f32 %v699_v3, 0.0  ;;  %1723 = vmatmul.msk.f32.gmra.mxu3 %vm587_vm1, %v578_v1 }
 0x14b   : > { %1731 = vmatmul.msk.f32.gmra.mxu2 %vm587_vm1, %v756_v4 }
 0x14e   : > { %v701_v5 = vpop.f32.mrf.mxu1 }
 0x14f   : > { %v702_v6 = vadd.f32 %v2064_v19, %v701_v5 }
 0x151   : > { %v757_v7 = vmax.f32 %v702_v6, 0.0 }
 0x153   : > { %1732 = vmatmul.msk.f32.gmra.mxu2 %vm587_vm1, %v757_v7 }
 0x156   : > { %v704_v8 = vpop.f32.mrf.mxu1 }
 0x157   : > { %v705_v24 = vadd.f32 %v2064_v19, %v704_v8 }
 0x159   : > { %v758_v9 = vmax.f32 %v705_v24, 0.0 }
 0x15b   : > { %1733 = vmatmul.msk.f32.gmra.mxu2 %vm587_vm1, %v758_v9 }
 0x15e   : > { %v707_v10 = vpop.f32.mrf.mxu1 }
 0x15f   : > { %v708_v11 = vadd.f32 %v2064_v19, %v707_v10 }
 0x161   : > { %v759_v12 = vmax.f32 %v708_v11, 0.0 }
 0x163   : > { %1734 = vmatmul.msk.f32.gmra.mxu2 %vm587_vm1, %v759_v12 }
 0x166   : > { %v710_v13 = vpop.f32.mrf.mxu1 }
 0x167   : > { %v711_v14 = vadd.f32 %v2064_v19, %v710_v13 }
 0x169   : > { %v760_v15 = vmax.f32 %v711_v14, 0.0 }
 0x16b   : > { %1735 = vmatmul.msk.f32.gmra.mxu2 %vm587_vm1, %v760_v15 }
 0x16e   : > { %v713_v16 = vpop.f32.mrf.mxu1 }
 0x16f   : > { %v714_v17 = vadd.f32 %v2064_v19, %v713_v16 }
 0x171   : > { %v761_v18 = vmax.f32 %v714_v17, 0.0 }
 0x173   : > { %1736 = vmatmul.msk.f32.gmra.mxu2 %vm587_vm1, %v761_v18 }
 0x176   : > { %v716_v20 = vpop.f32.mrf.mxu1 }
 0x177   : > { %v717_v21 = vadd.f32 %v2064_v19, %v716_v20 }
 0x179   : > { %v762_v22 = vmax.f32 %v717_v21, 0.0 }
 0x17b   : > { %1737 = vmatmul.msk.f32.gmra.mxu2 %vm587_vm1, %v762_v22 }
 0x17e   : > { %v719_v23 = vpop.f32.mrf.mxu1 }
 0x17f   : > { %v720_v25 = vadd.f32 %v2064_v19, %v719_v23 }
 0x181   : > { %v763_v26 = vmax.f32 %v720_v25, 0.0 }
 0x183   : > { %1738 = vmatmul.msk.f32.gmra.mxu2 %vm587_vm1, %v763_v26 }
 0x186   : > { %v722_v27 = vpop.f32.mrf.mxu1 }
 0x187   : > { %v723_v28 = vadd.f32 %v2064_v19, %v722_v27 }
 0x189   : > { %v764_v29 = vmax.f32 %v723_v28, 0.0 }
 0x18b   : > { %1739 = vmatmul.msk.f32.gmra.mxu2 %vm587_vm1, %v764_v29 }
 0x18e   : > { %v725_v30 = vpop.f32.mrf.mxu1 }
 0x18f   : > { %v726_v31 = vadd.f32 %v2064_v19, %v725_v30 }
 0x191   : > { %v765_v32 = vmax.f32 %v726_v31, 0.0 }
 0x193   : > { %1740 = vmatmul.msk.f32.gmra.mxu2 %vm587_vm1, %v765_v32 }
 0x196   : > { %v728_v34 = vpop.f32.mrf.mxu1  ;;  %v870_v35 = vpop.f32.mrf.mxu2 }
 0x197   : > { %v729_v36 = vadd.f32 %v2064_v19, %v728_v34  ;;  %v871_v37 = vadd.f32 %v2119_v33, %v870_v35 }
 0x199   : > { %v766_v38 = vmax.f32 %v729_v36, 0.0  ;;  %v966_v39 = vmin.f32 %v871_v37, 20.0  ;;  %vm942_vm3 = vcmp.gt.f32.partialorder %v871_v37, 20.0 }
 0x19b   : > { %v990_v40 = vmul.f32 1.442695, %v966_v39  ;;  %1741 = vmatmul.msk.f32.gmra.mxu2 %vm587_vm1, %v766_v38 }
 0x19d   : > { %1773 = vpow2.f32 %v990_v40 }
 0x19e   : > { %v873_v41 = vpop.f32.mrf.mxu2 }
 0x19f   : > { %v2125_v42 = vadd.f32 %v2119_v33, %v873_v41 }
 0x1a1   : > { %v967_v43 = vmin.f32 %v2125_v42, 20.0  ;;  %vm943_vm6 = vcmp.gt.f32.partialorder %v2125_v42, 20.0 }
 0x1a3   : > { %v1774_v44 = vpop.eup %1773  ;;  %v992_v45 = vmul.f32 1.442695, %v967_v43 }
 0x1a4   : > { %v731_v46 = vpop.f32.mrf.mxu3  ;;  %v1038_v47 = vadd.f32 1.0, %v1774_v44  ;;  %v1041_v48 = vmul.f32 -0.5, %v1774_v44  ;;  %v1044_v55 = vand.u32 2147483647, %v1774_v44 }
 0x1a5   : > { %1775 = vpow2.f32 %v992_v45  ;;  %v732_v49 = vadd.f32 %v2064_v19, %v731_v46 }
 0x1a6   : > { %v876_v50 = vpop.f32.mrf.mxu2  ;;  %1777 = vlog2.f32 %v1038_v47  ;;  %v1042_v53 = vadd.f32 1.0, %v1041_v48  ;;  %vm1045_vm2 = vcmp.lt.f32.partialorder %v1044_v55, 0.0004427343 }
 0x1a7   : > { %v767_v51 = vmax.f32 %v732_v49, 0.0  ;;  %v2130_v52 = vadd.f32 %v2119_v33, %v876_v50 }
 0x1a8   : > { %v1043_v60 = vmul.f32 %v1774_v44, %v1042_v53 }
 0x1a9   : > { %v968_v54 = vmin.f32 %v2130_v52, 20.0  ;;  %1742 = vmatmul.msk.f32.vlgmr.msra.gmra.mxu3 %vm587_vm1, %v767_v51  ;;  %vm944_vm8 = vcmp.gt.f32.partialorder %v2130_v52, 20.0 }
 0x1ab   : > { %v1776_v56 = vpop.eup %1775  ;;  %v994_v57 = vmul.f32 1.442695, %v968_v54 }
 0x1ac   : > { %v1778_v58 = vpop.eup %1777  ;;  %v734_v59 = vpop.f32.mrf.mxu3  ;;  %v1047_v61 = vadd.f32 1.0, %v1776_v56  ;;  %v1050_v0 = vmul.f32 -0.5, %v1776_v56  ;;  %v1053_v24 = vand.u32 2147483647, %v1776_v56 }
 0x1ad   : > { %1779 = vpow2.f32 %v994_v57  ;;  %v735_v62 = vadd.f32 %v2064_v19, %v734_v59  ;;  %v1040_v63 = vmul.f32 0.6931472, %v1778_v58 }
 0x1ae   : > { %v879_v1 = vpop.f32.mrf.mxu2  ;;  %1781 = vlog2.f32 %v1047_v61  ;;  %v1051_v8 = vadd.f32 1.0, %v1050_v0  ;;  %vm1054_vm5 = vcmp.lt.f32.partialorder %v1053_v24, 0.0004427343 }
 0x1af   : > { %v768_v2 = vmax.f32 %v735_v62, 0.0  ;;  %v2136_v3 = vadd.f32 %v2119_v33, %v879_v1  ;;  %v1046_v4 = vsel %vm1045_vm2, %v1043_v60, %v1040_v63 }
 0x1b0   : > { %v1254_v5 = vsel %vm942_vm3, %v871_v37, %v1046_v4  ;;  %v1052_v17 = vmul.f32 %v1776_v56, %v1051_v8 }
 0x1b1   : > { %v969_v6 = vmin.f32 %v2136_v3, 20.0  ;;  %1743 = vmatmul.msk.f32.gmra.mxu3 %vm587_vm1, %v768_v2  ;;  %v1278_v7 = vadd.f32 0.0001, %v1254_v5  ;;  %vm945_vm10 = vcmp.gt.f32.partialorder %v2136_v3, 20.0 }
 0x1b3   : > { %v1780_v9 = vpop.eup %1779  ;;  %v996_v10 = vmul.f32 1.442695, %v969_v6  ;;  %1351 = vrot.lane.b32.xlu0 %v1278_v7, %s1878_s26  ;;  %1303 = vst.msk [vmem:[%s2142_s25] sm:$0xff] %vm1302_vm4, %v1278_v7 }
 0x1b4   : > { %v1782_v11 = vpop.eup %1781  ;;  %v737_v12 = vpop.f32.mrf.mxu3  ;;  %v1056_v13 = vadd.f32 1.0, %v1780_v9  ;;  %v1059_v14 = vmul.f32 -0.5, %v1780_v9  ;;  %v1062_v28 = vand.u32 2147483647, %v1780_v9 }
 0x1b5   : > { %1783 = vpow2.f32 %v996_v10  ;;  %v738_v15 = vadd.f32 %v2064_v19, %v737_v12  ;;  %v1049_v16 = vmul.f32 0.6931472, %v1782_v11 }
 0x1b6   : > { %v882_v18 = vpop.f32.mrf.mxu2  ;;  %1785 = vlog2.f32 %v1056_v13  ;;  %v1060_v25 = vadd.f32 1.0, %v1059_v14  ;;  %vm1063_vm7 = vcmp.lt.f32.partialorder %v1062_v28, 0.0004427343 }
 0x1b7   : > { %v769_v20 = vmax.f32 %v738_v15, 0.0  ;;  %v2152_v21 = vadd.f32 %v2119_v33, %v882_v18  ;;  %v1055_v22 = vsel %vm1054_vm5, %v1052_v17, %v1049_v16 }
 0x1b8   : > { %v1255_v23 = vsel %vm943_vm6, %v2125_v42, %v1055_v22  ;;  %v1061_v34 = vmul.f32 %v1780_v9, %v1060_v25 }
 0x1b9   : > { %v970_v26 = vmin.f32 %v2152_v21, 20.0  ;;  %1744 = vmatmul.msk.f32.gmra.mxu3 %vm587_vm1, %v769_v20  ;;  %v1279_v27 = vadd.f32 0.0001, %v1255_v23  ;;  %vm946_vm12 = vcmp.gt.f32.partialorder %v2152_v21, 20.0 }
 0x1bb   : > { %v1784_v29 = vpop.eup %1783  ;;  %v998_v30 = vmul.f32 1.442695, %v970_v26  ;;  %1449 = vrot.lane.b32.xlu1 %v1279_v27, %s1879_s27  ;;  %1304 = vst.msk [vmem:[%s2142_s25 + $0x8] sm:$0xff] %vm1302_vm4, %v1279_v27  ;;  %1447 = vrot.lane.b32.xlu0 %v1278_v7, %s1879_s27 }
 0x1bc   : > { %v1786_v31 = vpop.eup %1785  ;;  %v740_v32 = vpop.f32.mrf.mxu3  ;;  %v1065_v35 = vadd.f32 1.0, %v1784_v29  ;;  %v1068_v38 = vmul.f32 -0.5, %v1784_v29  ;;  %v1071_v47 = vand.u32 2147483647, %v1784_v29 }
 0x1bd   : > { %1787 = vpow2.f32 %v998_v30  ;;  %v741_v36 = vadd.f32 %v2064_v19, %v740_v32  ;;  %v1058_v37 = vmul.f32 0.6931472, %v1786_v31 }
 0x1be   : > { %v885_v39 = vpop.f32.mrf.mxu2  ;;  %1789 = vlog2.f32 %v1065_v35  ;;  %v1069_v46 = vadd.f32 1.0, %v1068_v38  ;;  %vm1072_vm9 = vcmp.lt.f32.partialorder %v1071_v47, 0.0004427343 }
 0x1bf   : > { %v770_v40 = vmax.f32 %v741_v36, 0.0  ;;  %v2164_v41 = vadd.f32 %v2119_v33, %v885_v39  ;;  %v1064_v42 = vsel %vm1063_vm7, %v1061_v34, %v1058_v37 }
 0x1c0   : > { %v1256_v43 = vsel %vm944_vm8, %v2130_v52, %v1064_v42  ;;  %v1070_v56 = vmul.f32 %v1784_v29, %v1069_v46 }
 0x1c1   : > { %v971_v44 = vmin.f32 %v2164_v41, 20.0  ;;  %1745 = vmatmul.msk.f32.gmra.mxu3 %vm587_vm1, %v770_v40  ;;  %v1280_v45 = vadd.f32 0.0001, %v1256_v43  ;;  %vm947_vm14 = vcmp.gt.f32.partialorder %v2164_v41, 20.0 }
 0x1c3   : > { %v1788_v48 = vpop.eup %1787  ;;  %v1000_v49 = vmul.f32 1.442695, %v971_v44  ;;  %1451 = vrot.lane.b32.xlu2 %v1280_v45, %s1879_s27  ;;  %1305 = vst.msk [vmem:[%s2142_s25 + $0x10] sm:$0xff] %vm1302_vm4, %v1280_v45  ;;  %1355 = vrot.lane.b32.xlu1 %v1280_v45, %s1878_s26 }
 0x1c4   : > { %v1790_v50 = vpop.eup %1789  ;;  %1353 = vrot.lane.b32.xlu0 %v1279_v27, %s1878_s26  ;;  %v743_v51 = vpop.f32.mrf.mxu3  ;;  %v1074_v52 = vadd.f32 1.0, %v1788_v48  ;;  %v1077_v53 = vmul.f32 -0.5, %v1788_v48  ;;  %v1080_v1 = vand.u32 2147483647, %v1788_v48 }
 0x1c5   : > { %1791 = vpow2.f32 %v1000_v49  ;;  %v744_v54 = vadd.f32 %v2064_v19, %v743_v51  ;;  %v1067_v55 = vmul.f32 0.6931472, %v1790_v50 }
 0x1c6   : > { %v888_v57 = vpop.f32.mrf.mxu2  ;;  %1793 = vlog2.f32 %v1074_v52  ;;  %v1078_v62 = vadd.f32 1.0, %v1077_v53  ;;  %vm1081_vm11 = vcmp.lt.f32.partialorder %v1080_v1, 0.0004427343 }
 0x1c7   : > { %v771_v58 = vmax.f32 %v744_v54, 0.0  ;;  %v2177_v59 = vadd.f32 %v2119_v33, %v888_v57  ;;  %v1073_v60 = vsel %vm1072_vm9, %v1070_v56, %v1067_v55 }
 0x1c8   : > { %v1257_v61 = vsel %vm945_vm10, %v2136_v3, %v1073_v60  ;;  %v1079_v7 = vmul.f32 %v1788_v48, %v1078_v62 }
 0x1c9   : > { %v972_v63 = vmin.f32 %v2177_v59, 20.0  ;;  %1746 = vmatmul.msk.f32.gmra.mxu3 %vm587_vm1, %v771_v58  ;;  %v1281_v0 = vadd.f32 0.0001, %v1257_v61  ;;  %vm948_vm0 = vcmp.gt.f32.partialorder %v2177_v59, 20.0 }
 0x1cb   : > { %v1792_v2 = vpop.eup %1791  ;;  %v1002_v4 = vmul.f32 1.442695, %v972_v63  ;;  %1306 = vst.msk [vmem:[%s2142_s25 + $0x18] sm:$0xff] %vm1302_vm4, %v1281_v0  ;;  %1357 = vrot.lane.b32.xlu1 %v1281_v0, %s1878_s26 }
 0x1cc   : > { %v1794_v5 = vpop.eup %1793  ;;  %1453 = vrot.lane.b32.xlu0 %v1281_v0, %s1879_s27  ;;  %v746_v6 = vpop.f32.mrf.mxu3  ;;  %v1083_v8 = vadd.f32 1.0, %v1792_v2  ;;  %v1086_v9 = vmul.f32 -0.5, %v1792_v2  ;;  %v1089_v17 = vand.u32 2147483647, %v1792_v2 }
 0x1cd   : > { %1795 = vpow2.f32 %v1002_v4  ;;  %v747_v3 = vadd.f32 %v2064_v19, %v746_v6  ;;  %v1076_v24 = vmul.f32 0.6931472, %v1794_v5 }
 0x1ce   : > { %v891_v10 = vpop.f32.mrf.mxu2  ;;  %1797 = vlog2.f32 %v1083_v8  ;;  %v1087_v16 = vadd.f32 1.0, %v1086_v9  ;;  %vm1090_vm13 = vcmp.lt.f32.partialorder %v1089_v17, 0.0004427343 }
 0x1cf   : > { %v772_v11 = vmax.f32 %v747_v3, 0.0  ;;  %v2189_v12 = vadd.f32 %v2119_v33, %v891_v10  ;;  %v1082_v13 = vsel %vm1081_vm11, %v1079_v7, %v1076_v24 }
 0x1d0   : > { %v1258_v14 = vsel %vm946_vm12, %v2152_v21, %v1082_v13  ;;  %v1088_v21 = vmul.f32 %v1792_v2, %v1087_v16 }
 0x1d1   : > { %v973_v15 = vmin.f32 %v2189_v12, 20.0  ;;  %1747 = vmatmul.msk.f32.gmra.mxu3 %vm587_vm1, %v772_v11  ;;  %v1282_v19 = vadd.f32 0.0001, %v1258_v14  ;;  %vm949_vm2 = vcmp.gt.f32.partialorder %v2189_v12, 20.0 }
 0x1d3   : > { %v1796_v18 = vpop.eup %1795  ;;  %v1004_v20 = vmul.f32 1.442695, %v973_v15  ;;  %1307 = vst.msk [vmem:[%s2142_s25 + $0x20] sm:$0xff] %vm1302_vm4, %v1282_v19  ;;  %1359 = vrot.lane.b32.xlu2 %v1282_v19, %s1878_s26  ;;  %1455 = vrot.lane.b32.xlu1 %v1282_v19, %s1879_s27 }
 0x1d4   : > { %v1798_v22 = vpop.eup %1797  ;;  %v1092_v23 = vadd.f32 1.0, %v1796_v18  ;;  %v1095_v26 = vmul.f32 -0.5, %v1796_v18  ;;  %v1098_v35 = vand.u32 2147483647, %v1796_v18 }
 0x1d5   : > { %1799 = vpow2.f32 %v1004_v20  ;;  %v1085_v25 = vmul.f32 0.6931472, %v1798_v22 }
 0x1d6   : > { %v894_v27 = vpop.f32.mrf.mxu2  ;;  %1801 = vlog2.f32 %v1092_v23  ;;  %v1096_v34 = vadd.f32 1.0, %v1095_v26  ;;  %vm1099_vm15 = vcmp.lt.f32.partialorder %v1098_v35, 0.0004427343 }
 0x1d7   : > { %v2200_v28 = vadd.f32 %v2119_v33, %v894_v27  ;;  %v1091_v29 = vsel %vm1090_vm13, %v1088_v21, %v1085_v25 }
 0x1d8   : > { %v1259_v30 = vsel %vm947_vm14, %v2164_v41, %v1091_v29  ;;  %v1097_v42 = vmul.f32 %v1796_v18, %v1096_v34 }
 0x1d9   : > { %v974_v31 = vmin.f32 %v2200_v28, 20.0  ;;  %v1283_v32 = vadd.f32 0.0001, %v1259_v30  ;;  %vm950_vm5 = vcmp.gt.f32.partialorder %v2200_v28, 20.0 }
 0x1db   : > { %v1800_v36 = vpop.eup %1799  ;;  %v1006_v37 = vmul.f32 1.442695, %v974_v31  ;;  %1308 = vst.msk [vmem:[%s2142_s25 + $0x28] sm:$0xff] %vm1302_vm4, %v1283_v32  ;;  %1361 = vrot.lane.b32.xlu2 %v1283_v32, %s1878_s26 }
 0x1dc   : > { %v1802_v38 = vpop.eup %1801  ;;  %v1101_v39 = vadd.f32 1.0, %v1800_v36  ;;  %v1104_v43 = vmul.f32 -0.5, %v1800_v36  ;;  %v1107_v50 = vand.u32 2147483647, %v1800_v36 }
 0x1dd   : > { %1803 = vpow2.f32 %v1006_v37  ;;  %v1094_v40 = vmul.f32 0.6931472, %v1802_v38 }
 0x1de   : > { %v897_v44 = vpop.f32.mrf.mxu2  ;;  %1805 = vlog2.f32 %v1101_v39  ;;  %v1105_v49 = vadd.f32 1.0, %v1104_v43  ;;  %vm1108_vm1 = vcmp.lt.f32.partialorder %v1107_v50, 0.0004427343 }
 0x1df   : > { %v2209_v41 = vadd.f32 %v2119_v33, %v897_v44  ;;  %v1100_v45 = vsel %vm1099_vm15, %v1097_v42, %v1094_v40 }
 0x1e0   : > { %v1260_v46 = vsel %vm948_vm0, %v2177_v59, %v1100_v45  ;;  %v1106_v56 = vmul.f32 %v1800_v36, %v1105_v49 }
 0x1e1   : > { %v975_v47 = vmin.f32 %v2209_v41, 20.0  ;;  %v1284_v48 = vadd.f32 0.0001, %v1260_v46  ;;  %vm951_vm7 = vcmp.gt.f32.partialorder %v2209_v41, 20.0 }
 0x1e3   : > { %v1804_v51 = vpop.eup %1803  ;;  %v1008_v52 = vmul.f32 1.442695, %v975_v47  ;;  %1457 = vrot.lane.b32.xlu2 %v1283_v32, %s1879_s27  ;;  %1309 = vst.msk [vmem:[%s2142_s25 + $0x30] sm:$0xff] %vm1302_vm4, %v1284_v48  ;;  %1363 = vrot.lane.b32.xlu0 %v1284_v48, %s1878_s26 }
 0x1e4   : > { %v1806_v53 = vpop.eup %1805  ;;  %v1110_v54 = vadd.f32 1.0, %v1804_v51  ;;  %v1113_v57 = vmul.f32 -0.5, %v1804_v51  ;;  %v1116_v1 = vand.u32 2147483647, %v1804_v51 }
 0x1e5   : > { %1807 = vpow2.f32 %v1008_v52  ;;  %v1103_v55 = vmul.f32 0.6931472, %v1806_v53 }
 0x1e6   : > { %v900_v58 = vpop.f32.mrf.mxu2  ;;  %1809 = vlog2.f32 %v1110_v54  ;;  %v1114_v0 = vadd.f32 1.0, %v1113_v57  ;;  %vm1117_vm3 = vcmp.lt.f32.partialorder %v1116_v1, 0.0004427343 }
 0x1e7   : > { %v2219_v59 = vadd.f32 %v2119_v33, %v900_v58  ;;  %v1109_v60 = vsel %vm1108_vm1, %v1106_v56, %v1103_v55 }
 0x1e8   : > { %v1261_v61 = vsel %vm949_vm2, %v2189_v12, %v1109_v60  ;;  %v1115_v8 = vmul.f32 %v1804_v51, %v1114_v0 }
 0x1e9   : > { %v976_v62 = vmin.f32 %v2219_v59, 20.0  ;;  %v1285_v63 = vadd.f32 0.0001, %v1261_v61  ;;  %vm952_vm9 = vcmp.gt.f32.partialorder %v2219_v59, 20.0 }
 0x1eb   : > { %v1808_v2 = vpop.eup %1807  ;;  %v1010_v4 = vmul.f32 1.442695, %v976_v62  ;;  %1310 = vst.msk [vmem:[%s2142_s25 + $0x38] sm:$0xff] %vm1302_vm4, %v1285_v63  ;;  %1365 = vrot.lane.b32.xlu1 %v1285_v63, %s1878_s26  ;;  %1459 = vrot.lane.b32.xlu0 %v1284_v48, %s1879_s27 }
 0x1ec   : > { %v1810_v5 = vpop.eup %1809  ;;  %v1119_v6 = vadd.f32 1.0, %v1808_v2  ;;  %v1122_v3 = vmul.f32 -0.5, %v1808_v2  ;;  %v1125_v15 = vand.u32 2147483647, %v1808_v2 }
 0x1ed   : > { %1811 = vpow2.f32 %v1010_v4  ;;  %v1112_v7 = vmul.f32 0.6931472, %v1810_v5 }
 0x1ee   : > { %v903_v24 = vpop.f32.mrf.mxu2  ;;  %1813 = vlog2.f32 %v1119_v6  ;;  %v1123_v14 = vadd.f32 1.0, %v1122_v3  ;;  %vm1126_vm6 = vcmp.lt.f32.partialorder %v1125_v15, 0.0004427343 }
 0x1ef   : > { %v2229_v9 = vadd.f32 %v2119_v33, %v903_v24  ;;  %v1118_v10 = vsel %vm1117_vm3, %v1115_v8, %v1112_v7 }
 0x1f0   : > { %v1262_v11 = vsel %vm950_vm5, %v2200_v28, %v1118_v10  ;;  %v1124_v22 = vmul.f32 %v1808_v2, %v1123_v14 }
 0x1f1   : > { %v977_v12 = vmin.f32 %v2229_v9, 20.0  ;;  %v1286_v13 = vadd.f32 0.0001, %v1262_v11  ;;  %vm953_vm11 = vcmp.gt.f32.partialorder %v2229_v9, 20.0 }
 0x1f3   : > { %v1812_v19 = vpop.eup %1811  ;;  %v1012_v16 = vmul.f32 1.442695, %v977_v12  ;;  %1311 = vst.msk [vmem:[%s2142_s25 + $0x40] sm:$0xff] %vm1302_vm4, %v1286_v13  ;;  %1367 = vrot.lane.b32.xlu2 %v1286_v13, %s1878_s26  ;;  %1461 = vrot.lane.b32.xlu1 %v1285_v63, %s1879_s27 }
 0x1f4   : > { %v1814_v17 = vpop.eup %1813  ;;  %v1128_v18 = vadd.f32 1.0, %v1812_v19  ;;  %v1131_v23 = vmul.f32 -0.5, %v1812_v19  ;;  %v1134_v31 = vand.u32 2147483647, %v1812_v19 }
 0x1f5   : > { %1815 = vpow2.f32 %v1012_v16  ;;  %v1121_v20 = vmul.f32 0.6931472, %v1814_v17 }
 0x1f6   : > { %v906_v25 = vpop.f32.mrf.mxu2  ;;  %1817 = vlog2.f32 %v1128_v18  ;;  %v1132_v30 = vadd.f32 1.0, %v1131_v23  ;;  %vm1135_vm8 = vcmp.lt.f32.partialorder %v1134_v31, 0.0004427343 }
 0x1f7   : > { %v2239_v21 = vadd.f32 %v2119_v33, %v906_v25  ;;  %v1127_v26 = vsel %vm1126_vm6, %v1124_v22, %v1121_v20 }
 0x1f8   : > { %v1263_v27 = vsel %vm951_vm7, %v2209_v41, %v1127_v26  ;;  %v1133_v38 = vmul.f32 %v1812_v19, %v1132_v30 }
 0x1f9   : > { %v978_v28 = vmin.f32 %v2239_v21, 20.0  ;;  %v1287_v29 = vadd.f32 0.0001, %v1263_v27  ;;  %vm954_vm13 = vcmp.gt.f32.partialorder %v2239_v21, 20.0 }
 0x1fb   : > { %v1816_v32 = vpop.eup %1815  ;;  %v1014_v34 = vmul.f32 1.442695, %v978_v28  ;;  %1463 = vrot.lane.b32.xlu2 %v1286_v13, %s1879_s27  ;;  %1312 = vst.msk [vmem:[%s2142_s25 + $0x48] sm:$0xff] %vm1302_vm4, %v1287_v29  ;;  %1369 = vrot.lane.b32.xlu0 %v1287_v29, %s1878_s26 }
 0x1fc   : > { %v1818_v35 = vpop.eup %1817  ;;  %v1137_v36 = vadd.f32 1.0, %v1816_v32  ;;  %v1140_v39 = vmul.f32 -0.5, %v1816_v32  ;;  %v1143_v47 = vand.u32 2147483647, %v1816_v32 }
 0x1fd   : > { %1819 = vpow2.f32 %v1014_v34  ;;  %v1130_v37 = vmul.f32 0.6931472, %v1818_v35 }
 0x1fe   : > { %v909_v40 = vpop.f32.mrf.mxu2  ;;  %1821 = vlog2.f32 %v1137_v36  ;;  %v1141_v46 = vadd.f32 1.0, %v1140_v39  ;;  %vm1144_vm10 = vcmp.lt.f32.partialorder %v1143_v47, 0.0004427343 }
 0x1ff   : > { %v2249_v42 = vadd.f32 %v2119_v33, %v909_v40  ;;  %v1136_v43 = vsel %vm1135_vm8, %v1133_v38, %v1130_v37 }
 0x200   : > { %v1264_v44 = vsel %vm952_vm9, %v2219_v59, %v1136_v43  ;;  %v1142_v53 = vmul.f32 %v1816_v32, %v1141_v46 }
 0x201   : > { %v979_v41 = vmin.f32 %v2249_v42, 20.0  ;;  %v1288_v45 = vadd.f32 0.0001, %v1264_v44  ;;  %vm955_vm15 = vcmp.gt.f32.partialorder %v2249_v42, 20.0 }
 0x203   : > { %v1820_v48 = vpop.eup %1819  ;;  %v1016_v49 = vmul.f32 1.442695, %v979_v41  ;;  %1313 = vst.msk [vmem:[%s2142_s25 + $0x50] sm:$0xff] %vm1302_vm4, %v1288_v45  ;;  %1371 = vrot.lane.b32.xlu1 %v1288_v45, %s1878_s26  ;;  %1465 = vrot.lane.b32.xlu0 %v1287_v29, %s1879_s27 }
 0x204   : > { %v1822_v50 = vpop.eup %1821  ;;  %v1146_v51 = vadd.f32 1.0, %v1820_v48  ;;  %v1149_v54 = vmul.f32 -0.5, %v1820_v48  ;;  %v1152_v62 = vand.u32 2147483647, %v1820_v48 }
 0x205   : > { %1823 = vpow2.f32 %v1016_v49  ;;  %v1139_v52 = vmul.f32 0.6931472, %v1822_v50 }
 0x206   : > { %v912_v55 = vpop.f32.mrf.mxu2  ;;  %1825 = vlog2.f32 %v1146_v51  ;;  %v1150_v61 = vadd.f32 1.0, %v1149_v54  ;;  %vm1153_vm12 = vcmp.lt.f32.partialorder %v1152_v62, 0.0004427343 }
 0x207   : > { %v2259_v56 = vadd.f32 %v2119_v33, %v912_v55  ;;  %v1145_v57 = vsel %vm1144_vm10, %v1142_v53, %v1139_v52 }
 0x208   : > { %v1265_v58 = vsel %vm953_vm11, %v2229_v9, %v1145_v57  ;;  %v1151_v5 = vmul.f32 %v1820_v48, %v1150_v61 }
 0x209   : > { %v980_v59 = vmin.f32 %v2259_v56, 20.0  ;;  %v1289_v60 = vadd.f32 0.0001, %v1265_v58  ;;  %vm956_vm1 = vcmp.gt.f32.partialorder %v2259_v56, 20.0 }
 0x20b   : > { %v1824_v63 = vpop.eup %1823  ;;  %v1018_v0 = vmul.f32 1.442695, %v980_v59  ;;  %1314 = vst.msk [vmem:[%s2142_s25 + $0x58] sm:$0xff] %vm1302_vm4, %v1289_v60  ;;  %1373 = vrot.lane.b32.xlu2 %v1289_v60, %s1878_s26  ;;  %1467 = vrot.lane.b32.xlu1 %v1288_v45, %s1879_s27 }
 0x20c   : > { %v1826_v1 = vpop.eup %1825  ;;  %v1155_v2 = vadd.f32 1.0, %v1824_v63  ;;  %v1158_v6 = vmul.f32 -0.5, %v1824_v63  ;;  %v1161_v12 = vand.u32 2147483647, %v1824_v63 }
 0x20d   : > { %1827 = vpow2.f32 %v1018_v0  ;;  %v1148_v4 = vmul.f32 0.6931472, %v1826_v1 }
 0x20e   : > { %v915_v7 = vpop.f32.mrf.mxu2  ;;  %1829 = vlog2.f32 %v1155_v2  ;;  %v1159_v11 = vadd.f32 1.0, %v1158_v6  ;;  %vm1162_vm14 = vcmp.lt.f32.partialorder %v1161_v12, 0.0004427343 }
 0x20f   : > { %v2269_v8 = vadd.f32 %v2119_v33, %v915_v7  ;;  %v1154_v3 = vsel %vm1153_vm12, %v1151_v5, %v1148_v4 }
 0x210   : > { %v1266_v24 = vsel %vm954_vm13, %v2239_v21, %v1154_v3  ;;  %v1160_v17 = vmul.f32 %v1824_v63, %v1159_v11 }
 0x211   : > { %v981_v9 = vmin.f32 %v2269_v8, 20.0  ;;  %v1290_v10 = vadd.f32 0.0001, %v1266_v24  ;;  %vm957_vm3 = vcmp.gt.f32.partialorder %v2269_v8, 20.0 }
 0x213   : > { %v1828_v13 = vpop.eup %1827  ;;  %v1020_v14 = vmul.f32 1.442695, %v981_v9  ;;  %1469 = vrot.lane.b32.xlu2 %v1289_v60, %s1879_s27  ;;  %1315 = vst.msk [vmem:[%s2142_s25 + $0x60] sm:$0xff] %vm1302_vm4, %v1290_v10  ;;  %1375 = vrot.lane.b32.xlu0 %v1290_v10, %s1878_s26 }
 0x214   : > { %v1830_v15 = vpop.eup %1829  ;;  %v1164_v19 = vadd.f32 1.0, %v1828_v13  ;;  %v1167_v18 = vmul.f32 -0.5, %v1828_v13  ;;  %v1170_v28 = vand.u32 2147483647, %v1828_v13 }
 0x215   : > { %1831 = vpow2.f32 %v1020_v14  ;;  %v1157_v16 = vmul.f32 0.6931472, %v1830_v15 }
 0x216   : > { %v918_v20 = vpop.f32.mrf.mxu2  ;;  %1833 = vlog2.f32 %v1164_v19  ;;  %v1168_v27 = vadd.f32 1.0, %v1167_v18  ;;  %vm1171_vm0 = vcmp.lt.f32.partialorder %v1170_v28, 0.0004427343 }
 0x217   : > { %v2279_v22 = vadd.f32 %v2119_v33, %v918_v20  ;;  %v1163_v23 = vsel %vm1162_vm14, %v1160_v17, %v1157_v16 }
 0x218   : > { %v1267_v25 = vsel %vm955_vm15, %v2249_v42, %v1163_v23  ;;  %v1169_v36 = vmul.f32 %v1828_v13, %v1168_v27 }
 0x219   : > { %v982_v21 = vmin.f32 %v2279_v22, 20.0  ;;  %v1291_v26 = vadd.f32 0.0001, %v1267_v25  ;;  %vm958_vm6 = vcmp.gt.f32.partialorder %v2279_v22, 20.0 }
 0x21b   : > { %v1832_v29 = vpop.eup %1831  ;;  %v1022_v30 = vmul.f32 1.442695, %v982_v21  ;;  %1316 = vst.msk [vmem:[%s2142_s25 + $0x68] sm:$0xff] %vm1302_vm4, %v1291_v26  ;;  %1377 = vrot.lane.b32.xlu1 %v1291_v26, %s1878_s26  ;;  %1471 = vrot.lane.b32.xlu0 %v1290_v10, %s1879_s27 }
 0x21c   : > { %v1834_v31 = vpop.eup %1833  ;;  %v1173_v32 = vadd.f32 1.0, %v1832_v29  ;;  %v1176_v37 = vmul.f32 -0.5, %v1832_v29  ;;  %v1179_v45 = vand.u32 2147483647, %v1832_v29 }
 0x21d   : > { %1835 = vpow2.f32 %v1022_v30  ;;  %v1452_v34 = vpop.permute.xlu2 %1451  ;;  %v1166_v35 = vmul.f32 0.6931472, %v1834_v31 }
 0x21e   : > { %1521 = vst.msk [vmem:[%s2291_s10 + $0x10] sm:$0xff] %vm1302_vm4, %v1452_v34  ;;  %v921_v38 = vpop.f32.mrf.mxu2  ;;  %1837 = vlog2.f32 %v1173_v32  ;;  %v1177_v41 = vadd.f32 1.0, %v1176_v37  ;;  %vm1180_vm2 = vcmp.lt.f32.partialorder %v1179_v45, 0.0004427343 }
 0x21f   : > { %v2297_v39 = vadd.f32 %v2119_v33, %v921_v38  ;;  %v1172_v40 = vsel %vm1171_vm0, %v1169_v36, %v1166_v35 }
 0x220   : > { %v1268_v42 = vsel %vm956_vm1, %v2259_v56, %v1172_v40  ;;  %v1178_v52 = vmul.f32 %v1832_v29, %v1177_v41 }
 0x221   : > { %v983_v43 = vmin.f32 %v2297_v39, 20.0  ;;  %v1292_v44 = vadd.f32 0.0001, %v1268_v42  ;;  %vm959_vm8 = vcmp.gt.f32.partialorder %v2297_v39, 20.0 }
 0x223   : > { %v1836_v46 = vpop.eup %1835  ;;  %v1024_v47 = vmul.f32 1.442695, %v983_v43  ;;  %1317 = vst.msk [vmem:[%s2142_s25 + $0x70] sm:$0xff] %vm1302_vm4, %v1292_v44  ;;  %1379 = vrot.lane.b32.xlu2 %v1292_v44, %s1878_s26  ;;  %1473 = vrot.lane.b32.xlu1 %v1291_v26, %s1879_s27 }
 0x224   : > { %v1838_v48 = vpop.eup %1837  ;;  %v1182_v49 = vadd.f32 1.0, %v1836_v46  ;;  %v1185_v53 = vmul.f32 -0.5, %v1836_v46  ;;  %v1188_v58 = vand.u32 2147483647, %v1836_v46 }
 0x225   : > { %1839 = vpow2.f32 %v1024_v47  ;;  %v1352_v50 = vpop.permute.xlu0 %1351  ;;  %v1175_v51 = vmul.f32 0.6931472, %v1838_v48 }
 0x226   : > { %1423 = vst.msk [vmem:[%s2309_s13] sm:$0xff] %vm1302_vm4, %v1352_v50  ;;  %1841 = vlog2.f32 %v1182_v49  ;;  %v1186_v57 = vadd.f32 1.0, %v1185_v53  ;;  %vm1189_vm5 = vcmp.lt.f32.partialorder %v1188_v58, 0.0004427343 }
 0x227   : > { %v1181_v54 = vsel %vm1180_vm2, %v1178_v52, %v1175_v51 }
 0x228   : > { %v1269_v55 = vsel %vm957_vm3, %v2269_v8, %v1181_v54  ;;  %v1187_v4 = vmul.f32 %v1836_v46, %v1186_v57 }
 0x229   : > { %v1293_v56 = vadd.f32 0.0001, %v1269_v55 }
 0x22b   : > { %v1840_v59 = vpop.eup %1839  ;;  %1475 = vrot.lane.b32.xlu2 %v1292_v44, %s1879_s27  ;;  %1318 = vst.msk [vmem:[%s2142_s25 + $0x78] sm:$0xff] %vm1302_vm4, %v1293_v56  ;;  %1381 = vrot.lane.b32.xlu0 %v1293_v56, %s1878_s26 }
 0x22c   : > { %v1842_v60 = vpop.eup %1841  ;;  %v924_v61 = vpop.f32.mrf.mxu3  ;;  %v1191_v62 = vadd.f32 1.0, %v1840_v59  ;;  %v1194_v5 = vmul.f32 -0.5, %v1840_v59  ;;  %v1197_v11 = vand.u32 2147483647, %v1840_v59 }
 0x22d   : > { %v2320_v63 = vadd.f32 %v2119_v33, %v924_v61  ;;  %v1360_v0 = vpop.permute.xlu2 %1359  ;;  %v1450_v1 = vpop.permute.xlu1 %1449  ;;  %v1184_v2 = vmul.f32 0.6931472, %v1842_v60 }
 0x22e   : > { %1427 = vst.msk [vmem:[%s2309_s13 + $0x20] sm:$0xff] %vm1302_vm4, %v1360_v0  ;;  %v1448_v6 = vpop.permute.xlu0 %1447  ;;  %1843 = vlog2.f32 %v1191_v62  ;;  %v1195_v10 = vadd.f32 1.0, %v1194_v5  ;;  %vm1198_vm7 = vcmp.lt.f32.partialorder %v1197_v11, 0.0004427343 }
 0x22f   : > { %v984_v7 = vmin.f32 %v2320_v63, 20.0  ;;  %1520 = vst.msk [vmem:[%s2291_s10 + $0x8] sm:$0xff] %vm1302_vm4, %v1450_v1  ;;  %v1190_v8 = vsel %vm1189_vm5, %v1187_v4, %v1184_v2  ;;  %vm960_vm10 = vcmp.gt.f32.partialorder %v2320_v63, 20.0 }
 0x230   : > { %1519 = vst.msk [vmem:[%s2291_s10] sm:$0xff] %vm1302_vm4, %v1448_v6  ;;  %v1270_v3 = vsel %vm958_vm6, %v2279_v22, %v1190_v8  ;;  %v1196_v17 = vmul.f32 %v1840_v59, %v1195_v10 }
 0x231   : > { %v1026_v24 = vmul.f32 1.442695, %v984_v7  ;;  %v1294_v9 = vadd.f32 0.0001, %v1270_v3 }
 0x233   : > { %1845 = vpow2.f32 %v1026_v24  ;;  %1319 = vst.msk [vmem:[%s2142_s25 + $0x80] sm:$0xff] %vm1302_vm4, %v1294_v9  ;;  %1383 = vrot.lane.b32.xlu1 %v1294_v9, %s1878_s26  ;;  %1477 = vrot.lane.b32.xlu0 %v1293_v56, %s1879_s27 }
 0x234   : > { %v1844_v12 = vpop.eup %1843  ;;  %v927_v13 = vpop.f32.mrf.mxu3 }
 0x235   : > { %v2336_v14 = vadd.f32 %v2119_v33, %v927_v13  ;;  %v1362_v15 = vpop.permute.xlu2 %1361  ;;  %v1356_v19 = vpop.permute.xlu1 %1355  ;;  %v1193_v16 = vmul.f32 0.6931472, %v1844_v12  ;;  %v1869_v12 = vld [vmem:[%s2495_s6] ss:$0 sm:$0xff] }
 0x236   : > { %1428 = vst.msk [vmem:[%s2309_s13 + $0x28] sm:$0xff] %vm1302_vm4, %v1362_v15  ;;  %v1354_v18 = vpop.permute.xlu0 %1353 }
 0x237   : > { %v985_v20 = vmin.f32 %v2336_v14, 20.0  ;;  %1425 = vst.msk [vmem:[%s2309_s13 + $0x10] sm:$0xff] %vm1302_vm4, %v1356_v19  ;;  %v1199_v22 = vsel %vm1198_vm7, %v1196_v17, %v1193_v16  ;;  %vm961_vm12 = vcmp.gt.f32.partialorder %v2336_v14, 20.0 }
 0x238   : > { %1424 = vst.msk [vmem:[%s2309_s13 + $0x8] sm:$0xff] %vm1302_vm4, %v1354_v18  ;;  %v1271_v23 = vsel %vm959_vm8, %v2297_v39, %v1199_v22 }
 0x239   : > { %v1846_v25 = vpop.eup %1845  ;;  %v1028_v21 = vmul.f32 1.442695, %v985_v20  ;;  %v1295_v26 = vadd.f32 0.0001, %v1271_v23 }
 0x23a   : > { %v1200_v27 = vadd.f32 1.0, %v1846_v25  ;;  %v1203_v28 = vmul.f32 -0.5, %v1846_v25  ;;  %v1206_v37 = vand.u32 2147483647, %v1846_v25 }
 0x23b   : > { %1847 = vpow2.f32 %v1028_v21  ;;  %1320 = vst.msk [vmem:[%s2142_s25 + $0x88] sm:$0xff] %vm1302_vm4, %v1295_v26  ;;  %1385 = vrot.lane.b32.xlu2 %v1295_v26, %s1878_s26  ;;  %1479 = vrot.lane.b32.xlu1 %v1294_v9, %s1879_s27 }
 0x23c   : > { %v930_v29 = vpop.f32.mrf.mxu3  ;;  %1849 = vlog2.f32 %v1200_v27  ;;  %v1204_v36 = vadd.f32 1.0, %v1203_v28  ;;  %vm1207_vm9 = vcmp.lt.f32.partialorder %v1206_v37, 0.0004427343 }
 0x23d   : > { %v2352_v30 = vadd.f32 %v2119_v33, %v930_v29  ;;  %v1458_v31 = vpop.permute.xlu2 %1457  ;;  %v1358_v32 = vpop.permute.xlu1 %1357 }
 0x23e   : > { %1524 = vst.msk [vmem:[%s2291_s10 + $0x28] sm:$0xff] %vm1302_vm4, %v1458_v31  ;;  %v1454_v34 = vpop.permute.xlu0 %1453  ;;  %v1205_v44 = vmul.f32 %v1846_v25, %v1204_v36 }
 0x23f   : > { %v986_v35 = vmin.f32 %v2352_v30, 20.0  ;;  %1426 = vst.msk [vmem:[%s2309_s13 + $0x18] sm:$0xff] %vm1302_vm4, %v1358_v32  ;;  %vm962_vm14 = vcmp.gt.f32.partialorder %v2352_v30, 20.0 }
 0x240   : > { %1522 = vst.msk [vmem:[%s2291_s10 + $0x18] sm:$0xff] %vm1302_vm4, %v1454_v34 }
 0x241   : > { %v1848_v38 = vpop.eup %1847  ;;  %v1030_v39 = vmul.f32 1.442695, %v986_v35 }
 0x242   : > { %v1850_v40 = vpop.eup %1849  ;;  %v1209_v42 = vadd.f32 1.0, %v1848_v38  ;;  %v1212_v41 = vmul.f32 -0.5, %v1848_v38  ;;  %v1215_v53 = vand.u32 2147483647, %v1848_v38 }
 0x243   : > { %1851 = vpow2.f32 %v1030_v39  ;;  %1481 = vrot.lane.b32.xlu2 %v1295_v26, %s1879_s27  ;;  %v1202_v43 = vmul.f32 0.6931472, %v1850_v40 }
 0x244   : > { %v933_v45 = vpop.f32.mrf.mxu3  ;;  %1853 = vlog2.f32 %v1209_v42  ;;  %v1213_v52 = vadd.f32 1.0, %v1212_v41  ;;  %vm1216_vm11 = vcmp.lt.f32.partialorder %v1215_v53, 0.0004427343 }
 0x245   : > { %v2364_v46 = vadd.f32 %v2119_v33, %v933_v45  ;;  %v1456_v47 = vpop.permute.xlu1 %1455  ;;  %v1208_v48 = vsel %vm1207_vm9, %v1205_v44, %v1202_v43 }
 0x246   : > { %1523 = vst.msk [vmem:[%s2291_s10 + $0x20] sm:$0xff] %vm1302_vm4, %v1456_v47  ;;  %v1272_v49 = vsel %vm960_vm10, %v2320_v63, %v1208_v48  ;;  %v1214_v59 = vmul.f32 %v1848_v38, %v1213_v52 }
 0x247   : > { %v987_v50 = vmin.f32 %v2364_v46, 20.0  ;;  %v1296_v51 = vadd.f32 0.0001, %v1272_v49  ;;  %vm963_vm0 = vcmp.gt.f32.partialorder %v2364_v46, 20.0 }
 0x249   : > { %v1852_v54 = vpop.eup %1851  ;;  %v1032_v55 = vmul.f32 1.442695, %v987_v50  ;;  %1321 = vst.msk [vmem:[%s2142_s25 + $0x90] sm:$0xff] %vm1302_vm4, %v1296_v51  ;;  %1387 = vrot.lane.b32.xlu0 %v1296_v51, %s1878_s26 }
 0x24a   : > { %v1854_v56 = vpop.eup %1853  ;;  %v1218_v57 = vadd.f32 1.0, %v1852_v54  ;;  %v1221_v60 = vmul.f32 -0.5, %v1852_v54  ;;  %v1224_v6 = vand.u32 2147483647, %v1852_v54 }
 0x24b   : > { %1855 = vpow2.f32 %v1032_v55  ;;  %v1211_v58 = vmul.f32 0.6931472, %v1854_v56 }
 0x24c   : > { %v936_v61 = vpop.f32.mrf.mxu3  ;;  %1857 = vlog2.f32 %v1218_v57  ;;  %v1222_v5 = vadd.f32 1.0, %v1221_v60  ;;  %vm1225_vm13 = vcmp.lt.f32.partialorder %v1224_v6, 0.0004427343 }
 0x24d   : > { %v2375_v62 = vadd.f32 %v2119_v33, %v936_v61  ;;  %v1368_v63 = vpop.permute.xlu2 %1367  ;;  %v1217_v0 = vsel %vm1216_vm11, %v1214_v59, %v1211_v58 }
 0x24e   : > { %1431 = vst.msk [vmem:[%s2309_s13 + $0x40] sm:$0xff] %vm1302_vm4, %v1368_v63  ;;  %v1273_v1 = vsel %vm961_vm12, %v2336_v14, %v1217_v0  ;;  %v1223_v9 = vmul.f32 %v1852_v54, %v1222_v5 }
 0x24f   : > { %v988_v2 = vmin.f32 %v2375_v62, 20.0  ;;  %v1297_v4 = vadd.f32 0.0001, %v1273_v1  ;;  %vm964_vm2 = vcmp.gt.f32.partialorder %v2375_v62, 20.0 }
 0x251   : > { %v1856_v7 = vpop.eup %1855  ;;  %v1034_v8 = vmul.f32 1.442695, %v988_v2  ;;  %1322 = vst.msk [vmem:[%s2142_s25 + $0x98] sm:$0xff] %vm1302_vm4, %v1297_v4  ;;  %1389 = vrot.lane.b32.xlu1 %v1297_v4, %s1878_s26  ;;  %1483 = vrot.lane.b32.xlu0 %v1296_v51, %s1879_s27 }
 0x252   : > { %v1858_v33 = vpop.eup %1857  ;;  %v1227_v3 = vadd.f32 1.0, %v1856_v7  ;;  %v1230_v10 = vmul.f32 -0.5, %v1856_v7  ;;  %v1233_v22 = vand.u32 2147483647, %v1856_v7 }
 0x253   : > { %1859 = vpow2.f32 %v1034_v8  ;;  %v1220_v24 = vmul.f32 0.6931472, %v1858_v33 }
 0x254   : > { %v939_v11 = vpop.f32.mrf.mxu3  ;;  %1861 = vlog2.f32 %v1227_v3  ;;  %v1231_v20 = vadd.f32 1.0, %v1230_v10  ;;  %vm1234_vm15 = vcmp.lt.f32.partialorder %v1233_v22, 0.0004427343 }
 0x255   : > { %v2389_v13 = vadd.f32 %v1869_v12, %v939_v11  ;;  %v1464_v14 = vpop.permute.xlu2 %1463  ;;  %v1364_v15 = vpop.permute.xlu0 %1363  ;;  %v1226_v19 = vsel %vm1225_vm13, %v1223_v9, %v1220_v24 }
 0x256   : > { %1527 = vst.msk [vmem:[%s2291_s10 + $0x40] sm:$0xff] %vm1302_vm4, %v1464_v14  ;;  %v1274_v16 = vsel %vm962_vm14, %v2352_v30, %v1226_v19  ;;  %v1232_v28 = vmul.f32 %v1856_v7, %v1231_v20 }
 0x257   : > { %v989_v17 = vmin.f32 %v2389_v13, 20.0  ;;  %1429 = vst.msk [vmem:[%s2309_s13 + $0x30] sm:$0xff] %vm1302_vm4, %v1364_v15  ;;  %v1298_v18 = vadd.f32 0.0001, %v1274_v16  ;;  %vm965_vm5 = vcmp.gt.f32.partialorder %v2389_v13, 20.0 }
 0x259   : > { %v1860_v23 = vpop.eup %1859  ;;  %v1036_v25 = vmul.f32 1.442695, %v989_v17  ;;  %1323 = vst.msk [vmem:[%s2142_s25 + $0xa0] sm:$0xff] %vm1302_vm4, %v1298_v18  ;;  %1391 = vrot.lane.b32.xlu2 %v1298_v18, %s1878_s26  ;;  %1485 = vrot.lane.b32.xlu1 %v1297_v4, %s1879_s27 }
 0x25a   : > { %v1862_v21 = vpop.eup %1861  ;;  %v1236_v26 = vadd.f32 1.0, %v1860_v23  ;;  %v1239_v29 = vmul.f32 -0.5, %v1860_v23  ;;  %v1242_v37 = vand.u32 2147483647, %v1860_v23 }
 0x25b   : > { %1863 = vpow2.f32 %v1036_v25  ;;  %v1229_v27 = vmul.f32 0.6931472, %v1862_v21 }
 0x25c   : > { %1865 = vlog2.f32 %v1236_v26  ;;  %v1240_v36 = vadd.f32 1.0, %v1239_v29  ;;  %vm1243_vm1 = vcmp.lt.f32.partialorder %v1242_v37, 0.0004427343 }
 0x25d   : > { %v1366_v30 = vpop.permute.xlu1 %1365  ;;  %v1460_v31 = vpop.permute.xlu0 %1459  ;;  %v1235_v32 = vsel %vm1234_vm15, %v1232_v28, %v1229_v27 }
 0x25e   : > { %1430 = vst.msk [vmem:[%s2309_s13 + $0x38] sm:$0xff] %vm1302_vm4, %v1366_v30  ;;  %v1275_v34 = vsel %vm963_vm0, %v2364_v46, %v1235_v32  ;;  %v1241_v44 = vmul.f32 %v1860_v23, %v1240_v36 }
 0x25f   : > { %1525 = vst.msk [vmem:[%s2291_s10 + $0x30] sm:$0xff] %vm1302_vm4, %v1460_v31  ;;  %v1299_v35 = vadd.f32 0.0001, %v1275_v34 }
 0x261   : > { %v1864_v38 = vpop.eup %1863  ;;  %1487 = vrot.lane.b32.xlu2 %v1298_v18, %s1879_s27  ;;  %1324 = vst.msk [vmem:[%s2142_s25 + $0xa8] sm:$0xff] %vm1302_vm4, %v1299_v35  ;;  %1393 = vrot.lane.b32.xlu0 %v1299_v35, %s1878_s26 }
 0x262   : > { %v1866_v39 = vpop.eup %1865  ;;  %v1245_v40 = vadd.f32 1.0, %v1864_v38  ;;  %v1248_v42 = vmul.f32 -0.5, %v1864_v38  ;;  %v1251_v49 = vand.u32 2147483647, %v1864_v38 }
 0x263   : > { %v1238_v43 = vmul.f32 0.6931472, %v1866_v39 }
 0x264   : > { %1867 = vlog2.f32 %v1245_v40  ;;  %v1249_v47 = vadd.f32 1.0, %v1248_v42  ;;  %vm1252_vm3 = vcmp.lt.f32.partialorder %v1251_v49, 0.0004427343 }
 0x265   : > { %v1374_v41 = vpop.permute.xlu2 %1373  ;;  %v1462_v45 = vpop.permute.xlu1 %1461  ;;  %v1244_v46 = vsel %vm1243_vm1, %v1241_v44, %v1238_v43 }
 0x266   : > { %1434 = vst.msk [vmem:[%s2309_s13 + $0x58] sm:$0xff] %vm1302_vm4, %v1374_v41  ;;  %v1276_v48 = vsel %vm964_vm2, %v2375_v62, %v1244_v46  ;;  %v1250_v51 = vmul.f32 %v1864_v38, %v1249_v47 }
 0x267   : > { %1526 = vst.msk [vmem:[%s2291_s10 + $0x38] sm:$0xff] %vm1302_vm4, %v1462_v45  ;;  %v1300_v50 = vadd.f32 0.0001, %v1276_v48 }
 0x269   : > { %1325 = vst.msk [vmem:[%s2142_s25 + $0xb0] sm:$0xff] %vm1302_vm4, %v1300_v50  ;;  %1395 = vrot.lane.b32.xlu1 %v1300_v50, %s1878_s26  ;;  %1489 = vrot.lane.b32.xlu0 %v1299_v35, %s1879_s27 }
 0x26a   : > { %v1868_v52 = vpop.eup %1867 }
 0x26b   : > { %v1247_v53 = vmul.f32 0.6931472, %v1868_v52 }
 0x26d   : > { %v1470_v54 = vpop.permute.xlu2 %1469  ;;  %v1370_v55 = vpop.permute.xlu0 %1369  ;;  %v1253_v56 = vsel %vm1252_vm3, %v1250_v51, %v1247_v53 }
 0x26e   : > { %1530 = vst.msk [vmem:[%s2291_s10 + $0x58] sm:$0xff] %vm1302_vm4, %v1470_v54  ;;  %v1277_v57 = vsel %vm965_vm5, %v2389_v13, %v1253_v56 }
 0x26f   : > { %1432 = vst.msk [vmem:[%s2309_s13 + $0x48] sm:$0xff] %vm1302_vm4, %v1370_v55  ;;  %v1301_v58 = vadd.f32 0.0001, %v1277_v57 }
 0x271   : > { %1326 = vst.msk [vmem:[%s2142_s25 + $0xb8] sm:$0xff] %vm1302_vm4, %v1301_v58  ;;  %1397 = vrot.lane.b32.xlu2 %v1301_v58, %s1878_s26  ;;  %1491 = vrot.lane.b32.xlu1 %v1300_v50, %s1879_s27 }
 0x275   : > { %v1372_v59 = vpop.permute.xlu1 %1371  ;;  %v1466_v60 = vpop.permute.xlu0 %1465 }
 0x276   : > { %1433 = vst.msk [vmem:[%s2309_s13 + $0x50] sm:$0xff] %vm1302_vm4, %v1372_v59 }
 0x277   : > { %1528 = vst.msk [vmem:[%s2291_s10 + $0x48] sm:$0xff] %vm1302_vm4, %v1466_v60 }
 0x279   : > { %1493 = vrot.lane.b32.xlu2 %v1301_v58, %s1879_s27 }
 0x27d   : > { %v1380_v61 = vpop.permute.xlu2 %1379  ;;  %v1468_v62 = vpop.permute.xlu1 %1467 }
 0x27e   : > { %1437 = vst.msk [vmem:[%s2309_s13 + $0x70] sm:$0xff] %vm1302_vm4, %v1380_v61 }
 0x27f   : > { %1529 = vst.msk [vmem:[%s2291_s10 + $0x50] sm:$0xff] %vm1302_vm4, %v1468_v62 }
 0x285   : > { %v1476_v63 = vpop.permute.xlu2 %1475  ;;  %v1376_v0 = vpop.permute.xlu0 %1375 }
 0x286   : > { %1533 = vst.msk [vmem:[%s2291_s10 + $0x70] sm:$0xff] %vm1302_vm4, %v1476_v63 }
 0x287   : > { %1435 = vst.msk [vmem:[%s2309_s13 + $0x60] sm:$0xff] %vm1302_vm4, %v1376_v0 }
 0x28d   : > { %v1378_v1 = vpop.permute.xlu1 %1377  ;;  %v1472_v2 = vpop.permute.xlu0 %1471 }
 0x28e   : > { %1436 = vst.msk [vmem:[%s2309_s13 + $0x68] sm:$0xff] %vm1302_vm4, %v1378_v1 }
 0x28f   : > { %1531 = vst.msk [vmem:[%s2291_s10 + $0x60] sm:$0xff] %vm1302_vm4, %v1472_v2 }
 0x295   : > { %v1386_v4 = vpop.permute.xlu2 %1385  ;;  %v1474_v5 = vpop.permute.xlu1 %1473 }
 0x296   : > { %1440 = vst.msk [vmem:[%s2309_s13 + $0x88] sm:$0xff] %vm1302_vm4, %v1386_v4 }
 0x297   : > { %1532 = vst.msk [vmem:[%s2291_s10 + $0x68] sm:$0xff] %vm1302_vm4, %v1474_v5 }
 0x29d   : > { %v1482_v6 = vpop.permute.xlu2 %1481  ;;  %v1382_v7 = vpop.permute.xlu0 %1381 }
 0x29e   : > { %1536 = vst.msk [vmem:[%s2291_s10 + $0x88] sm:$0xff] %vm1302_vm4, %v1482_v6 }
 0x29f   : > { %1438 = vst.msk [vmem:[%s2309_s13 + $0x78] sm:$0xff] %vm1302_vm4, %v1382_v7 }
 0x2a5   : > { %v1384_v8 = vpop.permute.xlu1 %1383  ;;  %v1478_v33 = vpop.permute.xlu0 %1477 }
 0x2a6   : > { %1439 = vst.msk [vmem:[%s2309_s13 + $0x80] sm:$0xff] %vm1302_vm4, %v1384_v8 }
 0x2a7   : > { %1534 = vst.msk [vmem:[%s2291_s10 + $0x78] sm:$0xff] %vm1302_vm4, %v1478_v33 }
 0x2ad   : > { %v1480_v3 = vpop.permute.xlu1 %1479 }
 0x2ae   : > { %1535 = vst.msk [vmem:[%s2291_s10 + $0x80] sm:$0xff] %vm1302_vm4, %v1480_v3 }
 0x2b3   : > { %v1392_v24 = vpop.permute.xlu2 %1391 }
 0x2b4   : > { %1443 = vst.msk [vmem:[%s2309_s13 + $0xa0] sm:$0xff] %vm1302_vm4, %v1392_v24 }
 0x2bb   : > { %v1488_v9 = vpop.permute.xlu2 %1487  ;;  %v1388_v10 = vpop.permute.xlu0 %1387 }
 0x2bc   : > { %1539 = vst.msk [vmem:[%s2291_s10 + $0xa0] sm:$0xff] %vm1302_vm4, %v1488_v9 }
 0x2bd   : > { %1441 = vst.msk [vmem:[%s2309_s13 + $0x90] sm:$0xff] %vm1302_vm4, %v1388_v10 }
 0x2c3   : > { %v1390_v11 = vpop.permute.xlu1 %1389  ;;  %v1484_v12 = vpop.permute.xlu0 %1483 }
 0x2c4   : > { %1442 = vst.msk [vmem:[%s2309_s13 + $0x98] sm:$0xff] %vm1302_vm4, %v1390_v11 }
 0x2c5   : > { %1537 = vst.msk [vmem:[%s2291_s10 + $0x90] sm:$0xff] %vm1302_vm4, %v1484_v12 }
 0x2cb   : > { %v1398_v13 = vpop.permute.xlu2 %1397  ;;  %v1486_v14 = vpop.permute.xlu1 %1485 }
 0x2cc   : > { %1446 = vst.msk [vmem:[%s2309_s13 + $0xb8] sm:$0xff] %vm1302_vm4, %v1398_v13 }
 0x2cd   : > { %1538 = vst.msk [vmem:[%s2291_s10 + $0x98] sm:$0xff] %vm1302_vm4, %v1486_v14 }
 0x2d3   : > { %v1494_v15 = vpop.permute.xlu2 %1493  ;;  %v1394_v19 = vpop.permute.xlu0 %1393 }
 0x2d4   : > { %1542 = vst.msk [vmem:[%s2291_s10 + $0xb8] sm:$0xff] %vm1302_vm4, %v1494_v15 }
 0x2d5   : > { %1444 = vst.msk [vmem:[%s2309_s13 + $0xa8] sm:$0xff] %vm1302_vm4, %v1394_v19 }
 0x2db   : > { %v1396_v16 = vpop.permute.xlu1 %1395  ;;  %v1490_v17 = vpop.permute.xlu0 %1489 }
 0x2dc   : > { %1445 = vst.msk [vmem:[%s2309_s13 + $0xb0] sm:$0xff] %vm1302_vm4, %v1396_v16 }
 0x2dd   : > { %1540 = vst.msk [vmem:[%s2291_s10 + $0xa8] sm:$0xff] %vm1302_vm4, %v1490_v17 }
 0x2e3   : > { %v1492_v18 = vpop.permute.xlu1 %1491 }
 0x2e4   : > { %1541 = vst.msk [vmem:[%s2291_s10 + $0xb0] sm:$0xff] %vm1302_vm4, %v1492_v18 }
 0x2e5 PF: > { %s20_s30 = sadd.s32 1, %s1876_s30  }
 0x2e6   : > { %p17_p4 = scmp.ge.s32.totalorder %s20_s30, 4  }
 0x2e8   :  { %19 = sbr.rel (!%p17_p4) target bundleno = 1 (0x1), region = 102 }

</bundles_post_ra>
